<compile_context>
chip_gen: v7x
topology: tpu7x:2x2x1
jax: 0.10.0
libtpu: 0.0.40
codegen_flags: <defaults>
</compile_context>

<pallas_src>
import functools

import jax
import jax.numpy as jnp
from jax.experimental import pallas as pl
from jax.experimental.pallas import tpu as pltpu

FEATURE_D = 1280
FEATURE_H = 3
FEATURE_W = 3
FEATURE_EXTRACTOR_SIZE = FEATURE_D * FEATURE_H * FEATURE_W   # 11520
STARTING_SOFTMAX_NEURONS = 40
DROPOUT_P = 0.3


def _cloud_classifier_kernel(*refs, training: bool):
    """Single-step fused (dropout) + Linear kernel.

    Eval:  refs = (x_ref, w_ref, b_ref, o_ref)
    Train: refs = (x_ref, mask_ref, w_ref, b_ref, o_ref)

    x_ref:   (Bp, K)  flattened features
    mask_ref:(Bp, K)  inverted-dropout multiplier (0.0 or 1/(1-p))
    w_ref:   (N, K)   weight, untransposed (PyTorch layout)
    b_ref:   (1, N)   bias
    o_ref:   (Bp, N)  output
    """
    if training:
        x_ref, mask_ref, w_ref, b_ref, o_ref = refs
    else:
        x_ref, w_ref, b_ref, o_ref = refs
        mask_ref = None

    x = x_ref[...]
    if training:
        # Inverted dropout, fused with the matmul (mask precomputed on host).
        x = x * mask_ref[...]

    w = w_ref[...]
    # Feed the MXU in the weight's dtype (bf16 weights -> bf16 inputs);
    # accumulation stays f32 via preferred_element_type.
    x = x.astype(w.dtype)

    # Contract x dim-1 with w dim-1: (Bp, K) x (N, K) -> (Bp, N).
    # This is the "trans_b" MXU contraction, so no wrapper-side weight.T.
    acc = jax.lax.dot_general(
        x, w,
        dimension_numbers=(((1,), (1,)), ((), ())),
        preferred_element_type=jnp.float32,
    )
    o_ref[...] = (acc + b_ref[...].astype(jnp.float32)).astype(o_ref.dtype)


def cloud_classifier_forward(x_nchw, weight, bias, *, training=False,
                             dropout_rng=None):
    """x_nchw: (B, 1280, 3, 3). weight: (40, 11520). bias: (40,)."""
    B = x_nchw.shape[0]
    K = FEATURE_EXTRACTOR_SIZE
    N = STARTING_SOFTMAX_NEURONS

    # Flatten exactly like torch's x.view(-1, K) (row-major over C, H, W).
    x_flat = x_nchw.reshape(B, K)

    inputs = [x_flat]
    if training:
        if dropout_rng is None:
            raise ValueError("training=True requires dropout_rng")
        # TODO(synk): keep-mask comes from jax.random (same keep-prob 0.7 and
        # inverted 1/0.7 scaling); it does not bit-match torch's dropout RNG.
        keep = jax.random.bernoulli(dropout_rng, 1.0 - DROPOUT_P, (B, K))
        mask = keep.astype(x_flat.dtype) * jnp.asarray(
            1.0 / (1.0 - DROPOUT_P), x_flat.dtype)
        inputs.append(mask)

    # Pad the (tiny) batch up to a sublane multiple of 8. Weight bytes dominate
    # HBM traffic, so this padding is essentially free and avoids partially
    # masked tiles; the output is sliced back to B rows.
    B_pad = max(8, ((B + 7) // 8) * 8)
    if B_pad != B:
        inputs = [jnp.pad(a, ((0, B_pad - B), (0, 0))) for a in inputs]

    b2d = bias.reshape(1, N).astype(jnp.float32)

    in_specs = [pl.BlockSpec((B_pad, K), lambda i: (0, 0)) for _ in inputs]
    in_specs += [
        pl.BlockSpec((N, K), lambda i: (0, 0)),   # weight, untransposed
        pl.BlockSpec((1, N), lambda i: (0, 0)),   # bias
    ]
    inputs += [weight, b2d]

    kernel = functools.partial(_cloud_classifier_kernel, training=training)

    out = pl.pallas_call(
        kernel,
        out_shape=jax.ShapeDtypeStruct((B_pad, N), jnp.float32),
        grid=(1,),  # whole problem in one step; everything fits VMEM easily
        in_specs=in_specs,
        out_specs=pl.BlockSpec((B_pad, N), lambda i: (0, 0)),
        compiler_params=pltpu.CompilerParams(
            dimension_semantics=("arbitrary",)),
    )(*inputs)
    return out[:B]


if __name__ == "__main__":
    key = jax.random.PRNGKey(0)
    kx, kw, kb, kd = jax.random.split(key, 4)

    B = 2
    x = jax.random.normal(kx, (B, FEATURE_D, FEATURE_H, FEATURE_W),
                          dtype=jnp.float32)

    # Deterministic nn.Linear-style init (uniform in +/- 1/sqrt(fan_in)).
    bound = 1.0 / (FEATURE_EXTRACTOR_SIZE ** 0.5)
    weight = jax.random.uniform(
        kw, (STARTING_SOFTMAX_NEURONS, FEATURE_EXTRACTOR_SIZE),
        minval=-bound, maxval=bound, dtype=jnp.float32)
    bias = jax.random.uniform(
        kb, (STARTING_SOFTMAX_NEURONS,),
        minval=-bound, maxval=bound, dtype=jnp.float32)

    x_flat = x.reshape(B, FEATURE_EXTRACTOR_SIZE)

    # --- Eval mode (dropout = identity), f32 weights ---
    out = jax.block_until_ready(cloud_classifier_forward(x, weight, bias))
    ref = jnp.einsum("bk,nk->bn", x_flat, weight,
                     precision=jax.lax.Precision.HIGHEST) + bias
    assert out.shape == (B, STARTING_SOFTMAX_NEURONS)
    assert jnp.allclose(out, ref, atol=2e-3, rtol=2e-3)

    # --- Training mode: fused inverted dropout + Linear ---
    out_tr = jax.block_until_ready(
        cloud_classifier_forward(x, weight, bias, training=True,
                                 dropout_rng=kd))
    keep = jax.random.bernoulli(kd, 1.0 - DROPOUT_P,
                                (B, FEATURE_EXTRACTOR_SIZE))
    x_drop = x_flat * keep.astype(jnp.float32) / (1.0 - DROPOUT_P)
    ref_tr = jnp.einsum("bk,nk->bn", x_drop, weight,
                        precision=jax.lax.Precision.HIGHEST) + bias
    assert out_tr.shape == (B, STARTING_SOFTMAX_NEURONS)
    assert jnp.allclose(out_tr, ref_tr, atol=2e-3, rtol=2e-3)

    # --- bf16-weight path (halves the dominant HBM byte stream) ---
    out_bf16 = jax.block_until_ready(
        cloud_classifier_forward(x, weight.astype(jnp.bfloat16), bias))
    assert jnp.allclose(out_bf16, ref, atol=3e-2, rtol=3e-2)

    print("KERNEL_OK")
</pallas_src>

<mosaic_0001>
module attributes {stable_mosaic.version = 11 : i64} {
  func.func @_cloud_classifier_kernel(%arg0: i32, %arg1: memref<8x11520xf32, #tpu.memory_space<vmem>>, %arg2: memref<40x11520xf32, #tpu.memory_space<vmem>>, %arg3: memref<1x40xf32, #tpu.memory_space<vmem>>, %arg4: memref<8x40xf32, #tpu.memory_space<vmem>>) attributes {dimension_semantics = [#tpu.dimension_semantics<arbitrary>], iteration_bounds = array<i64: 1>, scalar_prefetch = 0 : i64, scratch_operands = 0 : i64, tpu.core_type = #tpu.core_type<tc>, window_params = [{pipeline_mode = #tpu.pipeline_mode<synchronous>, transform_indices = @transform_0, window_bounds = array<i64: 8, 11520>}, {pipeline_mode = #tpu.pipeline_mode<synchronous>, transform_indices = @transform_1, window_bounds = array<i64: 40, 11520>}, {pipeline_mode = #tpu.pipeline_mode<synchronous>, transform_indices = @transform_2, window_bounds = array<i64: 1, 40>}, {pipeline_mode = #tpu.pipeline_mode<synchronous>, transform_indices = @transform_3, window_bounds = array<i64: 8, 40>}]} {
    %c0 = arith.constant 0 : index
    %c0_0 = arith.constant 0 : index
    %0 = vector.load %arg1[%c0, %c0_0] : memref<8x11520xf32, #tpu.memory_space<vmem>>, vector<8x11520xf32>
    %c0_1 = arith.constant 0 : index
    %c0_2 = arith.constant 0 : index
    %1 = vector.load %arg2[%c0_1, %c0_2] : memref<40x11520xf32, #tpu.memory_space<vmem>>, vector<40x11520xf32>
    %cst = arith.constant dense<0.000000e+00> : vector<8x40xf32>
    %2 = tpu.matmul %0, %1, %cst {dimension_numbers = #tpu.dot_dimension_numbers<[1], [1], [0], [0], [0, 0, 1, 0], [], []>} : vector<8x11520xf32>, vector<40x11520xf32>, vector<8x40xf32> -> vector<8x40xf32>
    %c0_3 = arith.constant 0 : index
    %c0_4 = arith.constant 0 : index
    %3 = vector.load %arg3[%c0_3, %c0_4] : memref<1x40xf32, #tpu.memory_space<vmem>>, vector<1x40xf32>
    %4 = vector.broadcast %3 : vector<1x40xf32> to vector<8x40xf32>
    %5 = arith.addf %2, %4 : vector<8x40xf32>
    %c0_5 = arith.constant 0 : index
    %c0_6 = arith.constant 0 : index
    %6 = vector.load %arg4[%c0_5, %c0_6] : memref<8x40xf32, #tpu.memory_space<vmem>>, vector<8x40xf32>
    tpu.vector_store %arg4[%c0_5, %c0_6], %5 {strides = array<i32>} : memref<8x40xf32, #tpu.memory_space<vmem>>, vector<8x40xf32>,
    return
  }
  func.func @transform_0(%arg0: i32) -> (i32, i32) {
    %c0_i32 = arith.constant 0 : i32
    %c0_i32_0 = arith.constant 0 : i32
    %c0_i32_1 = arith.constant 0 : i32
    return %c0_i32, %c0_i32_0 : i32, i32
  }
  func.func @transform_1(%arg0: i32) -> (i32, i32) {
    %c0_i32 = arith.constant 0 : i32
    %c0_i32_0 = arith.constant 0 : i32
    %c0_i32_1 = arith.constant 0 : i32
    return %c0_i32, %c0_i32_0 : i32, i32
  }
  func.func @transform_2(%arg0: i32) -> (i32, i32) {
    %c0_i32 = arith.constant 0 : i32
    %c0_i32_0 = arith.constant 0 : i32
    %c0_i32_1 = arith.constant 0 : i32
    return %c0_i32, %c0_i32_0 : i32, i32
  }
  func.func @transform_3(%arg0: i32) -> (i32, i32) {
    %c0_i32 = arith.constant 0 : i32
    %c0_i32_0 = arith.constant 0 : i32
    %c0_i32_1 = arith.constant 0 : i32
    return %c0_i32, %c0_i32_0 : i32, i32
  }
}

</mosaic_0001>

<bundles_post_ra>
// kernel: tpu_custom_call.1
= control target key start
LH: loop header
LB: loop body
LE: loop exit
PB: predicated region body
PF: predicated region fallthrough
CT: control target
= control target key end

     0   :  { %8 = vsyncpa [#allocation3], 0  ;;  %s4390_s0 = inlined_call_operand.hbm [shape: f32[8,11520], index: 0, kind: input, shape index: {}]   ;;  %s4391_s1 = inlined_call_operand.hbm [shape: f32[40,11520], index: 1, kind: input, shape index: {}]   ;;  %s4392_s2 = inlined_call_operand.hbm [shape: f32[1,40], index: 2, kind: input, shape index: {}]   ;;  %s4393_s3 = inlined_call_operand.hbm [shape: f32[8,40], index: 3, kind: output, shape index: {}]  }
   0x1   :  { %9 = vsyncpa [#allocation6], 0 }
   0x2   :  { %10 = vsyncpa [#allocation4], 0  ;;  %s4316_s12 = smov [#allocation5]   ;;  %s4222_s16 = scalar_lea.hbm %s4391_s1, 57600 }
   0x3   :  { %s26_s13 = sshll.u32 %s4316_s12, 4  ;;  %p4223_p0 = scmp.ne.s32.totalorder %s4391_s1, %s4222_s16  ;;  %s27_s13 = int_to_ptr.vmem [resolvable:$true] %s26_s13 }
   0x4   :  { %p4226_p1 = scmp.lt.u32.totalorder %s4222_s16, %s4391_s1 }
   0x6   :  { %p4228_p2 = pnand %p4226_p1, %p4223_p0 }
   0x8   :  { %4231 = shalt.err (!%p4228_p2)
}
   0x9   :  { %s4232_s21 = scalar_lea.vmem %s27_s13, 57600  ;;  %p4237_p4 = scmp.lt.s32.totalorder %s27_s13, %s27_s13 }
   0xa   :  { %p4233_p3 = scmp.ne.s32.totalorder %s27_s13, %s4232_s21  ;;  %p4238_p5 = scmp.lt.s32.totalorder %s4232_s21, %s4232_s21 }
   0xc   :  { %p4239_p6 = por %p4238_p5, %p4237_p4 }
   0xe   :  { %p4240_p7 = pnand %p4239_p6, %p4233_p3 }
  0x10   :  { %4243 = shalt.err (!%p4240_p7)
}
  0x11   :  { %s4317_s22 = smov 11520   ;;  %s4318_s23 = smov 720  }
  0x12   :  { %32 = dma.hbm_to_vmem [thread:$0]  %s4391_s1, 57600, %s27_s13, [#allocation6], %s4317_s22, %s4317_s22, %s4318_s23  }
  0x13   :  { %s4319_s26 = smov [#allocation2]   ;;  %s4320_s28 = smov [#allocation7]  }
  0x14   :  { %s17_s27 = sshll.u32 %s4319_s26, 4  ;;  %s39_s29 = sshll.u32 %s4320_s28, 4  ;;  %s18_s27 = int_to_ptr.vmem [resolvable:$true] %s17_s27  ;;  %s40_s29 = int_to_ptr.vmem [resolvable:$true] %s39_s29 }
  0x15   :  { %s4244_s5 = scalar_lea.hbm %s4390_s0, 11520 }
  0x16   :  { %p4245_p8 = scmp.ne.s32.totalorder %s4390_s0, %s4244_s5  ;;  %p4248_p9 = scmp.lt.u32.totalorder %s4244_s5, %s4390_s0 }
  0x18   :  { %p4250_p10 = pnand %p4248_p9, %p4245_p8 }
  0x1a   :  { %4253 = shalt.err (!%p4250_p10)
}
  0x1b   :  { %s4254_s1 = scalar_lea.vmem %s18_s27, 11520  ;;  %p4259_p12 = scmp.lt.s32.totalorder %s18_s27, %s18_s27 }
  0x1c   :  { %p4255_p11 = scmp.ne.s32.totalorder %s18_s27, %s4254_s1  ;;  %p4260_p13 = scmp.lt.s32.totalorder %s4254_s1, %s4254_s1 }
  0x1e   :  { %p4261_p0 = por %p4260_p13, %p4259_p12 }
  0x20   :  { %p4262_p1 = pnand %p4261_p0, %p4255_p11 }
  0x22   :  { %4265 = shalt.err (!%p4262_p1)
}
  0x23   :  { %20 = dma.hbm_to_vmem [thread:$0]  %s4390_s0, 11520, %s18_s27, [#allocation3]  }
  0x24   :  { %s4266_s14 = scalar_lea.hbm %s4392_s2, 16 }
  0x25   :  { %p4267_p2 = scmp.ne.s32.totalorder %s4392_s2, %s4266_s14  ;;  %p4270_p3 = scmp.lt.u32.totalorder %s4266_s14, %s4392_s2 }
  0x27   :  { %p4272_p4 = pnand %p4270_p3, %p4267_p2 }
  0x29   :  { %4275 = shalt.err (!%p4272_p4)
}
  0x2a   :  { %s4276_s19 = scalar_lea.vmem %s40_s29, 16  ;;  %s4280_s20 = scalar_lea.vmem %s40_s29, 32 }
  0x2b   :  { %p4277_p5 = scmp.ne.s32.totalorder %s40_s29, %s4276_s19  ;;  %p4281_p6 = scmp.lt.s32.totalorder %s40_s29, %s40_s29 }
  0x2c   :  { %p4282_p7 = scmp.lt.s32.totalorder %s4280_s20, %s4276_s19 }
  0x2e   :  { %p4283_p8 = por %p4282_p7, %p4281_p6 }
  0x30   :  { %p4284_p9 = pnand %p4283_p8, %p4277_p5 }
  0x32   :  { %4287 = shalt.err (!%p4284_p9)
}
  0x33   :  { %42 = dma.hbm_to_vmem [thread:$0]  %s4392_s2, 16, %s40_s29, [#allocation6]  }
  0x34   :  { %4310 = dma.done.wait [#allocation3], 11520  }
  0x35   :  { %4311 = vsyncadd [#allocation3], 4294955776 }
  0x36   :  { %4312 = dma.done.wait [#allocation6], 57616  }
  0x37   :  { %4313 = vsyncadd [#allocation6], 4294909680  ;;  %v143_v0 = vld [vmem:[#allocation5 + $0x8] sm:$0xff]  ;;  %v233_v1 = vld [vmem:[#allocation5 + $0x2d8] sm:$0xff]  ;;  %s4321_s2 = smov [#allocation8]   ;;  %vm3749_vm0 = vcmask 326656  }
  0x38   :  { %v187_v2 = vld [vmem:[#allocation5 + $0x168] sm:$0xff]  ;;  %v3768_v3 = vpack.c.bf16 %v233_v1, %v143_v0  ;;  %v277_v4 = vld [vmem:[#allocation5 + $0x438] sm:$0xff]  ;;  %v142_v5 = vld [vmem:[#allocation5] sm:$0xff]  ;;  %s3757_s22 = sshll.u32 %s4321_s2, 4  ;;  %s3758_s22 = int_to_ptr.vmem [resolvable:$true] %s3757_s22 }
  0x39   :  { %v232_v6 = vld [vmem:[#allocation5 + $0x2d0] sm:$0xff]  ;;  %v3944_v7 = vpack.c.bf16 %v277_v4, %v187_v2  ;;  %v186_v9 = vld [vmem:[#allocation5 + $0x160] sm:$0xff]  ;;  %v323_v11 = vld [vmem:[#allocation5 + $0x5a8] sm:$0xff]  ;;  %s4288_s23 = scalar_lea.vmem %s3758_s22, 128  ;;  %p4293_p11 = scmp.lt.s32.totalorder %s3758_s22, %s3758_s22 }
  0x3a   :  { %v3770_v8 = vpack.c.bf16 %v232_v6, %v142_v5  ;;  %v276_v10 = vld [vmem:[#allocation5 + $0x430] sm:$0xff]  ;;  %3769 = vmatprep.subr.bf16.mxu1 %v3768_v3  ;;  %v413_v13 = vld [vmem:[#allocation5 + $0x878] sm:$0xff]  ;;  %v367_v14 = vld [vmem:[#allocation5 + $0x708] sm:$0xff]  ;;  %p4289_p10 = scmp.ne.s32.totalorder %s3758_s22, %s4288_s23  ;;  %p4294_p12 = scmp.lt.s32.totalorder %s4288_s23, %s4288_s23 }
  0x3b   :  { %v3946_v12 = vpack.c.bf16 %v276_v10, %v186_v9  ;;  %v457_v15 = vld [vmem:[#allocation5 + $0x9d8] sm:$0xff]  ;;  %3945 = vmatprep.subr.bf16.mxu0 %v3944_v7  ;;  %v3772_v16 = vpack.c.bf16 %v413_v13, %v323_v11  ;;  %v322_v18 = vld [vmem:[#allocation5 + $0x5a0] sm:$0xff]  ;;  %v412_v19 = vld [vmem:[#allocation5 + $0x870] sm:$0xff] }
  0x3c   :  { %3771 = vmatpush1.bf16.xpose.msra.mxu1 %v3770_v8  ;;  %v3948_v17 = vpack.c.bf16 %v457_v15, %v367_v14  ;;  %v366_v20 = vld [vmem:[#allocation5 + $0x700] sm:$0xff]  ;;  %v456_v21 = vld [vmem:[#allocation5 + $0x9d0] sm:$0xff]  ;;  %v53_v22 = vld [vmem:[#allocation2 + $0x8] sm:$0xff]  ;;  %v3774_v24 = vpack.c.bf16 %v412_v19, %v322_v18  ;;  %p4295_p13 = por %p4294_p12, %p4293_p11 }
  0x3d   :  { %3947 = vmatpush1.bf16.xpose.msra.mxu0 %v3946_v12  ;;  %3773 = vmatprep.subr.bf16.mxu1 %v3772_v16  ;;  %v97_v23 = vld [vmem:[#allocation2 + $0x168] sm:$0xff]  ;;  %v3950_v25 = vpack.c.bf16 %v456_v21, %v366_v20  ;;  %v503_v26 = vld [vmem:[#allocation5 + $0xb48] sm:$0xff]  ;;  %v502_v32 = vld [vmem:[#allocation5 + $0xb40] sm:$0xff] }
  0x3e   :  { %3949 = vmatprep.subr.bf16.mxu0 %v3948_v17  ;;  %663 = vmatprep.mubr.f32.mxu1 %v53_v22  ;;  %v547_v27 = vld [vmem:[#allocation5 + $0xca8] sm:$0xff]  ;;  %v145_v28 = vld [vmem:[#allocation5 + $0x18] sm:$0xff]  ;;  %v546_v33 = vld [vmem:[#allocation5 + $0xca0] sm:$0xff]  ;;  %p4296_p0 = pnand %p4295_p13, %p4289_p10 }
  0x3f   :  { %2203 = vmatprep.mubr.f32.mxu0 %v97_v23  ;;  %v235_v29 = vld [vmem:[#allocation5 + $0x2e8] sm:$0xff]  ;;  %v189_v30 = vld [vmem:[#allocation5 + $0x178] sm:$0xff]  ;;  %v144_v35 = vld [vmem:[#allocation5 + $0x10] sm:$0xff] }
  0x40   :  { %v279_v31 = vld [vmem:[#allocation5 + $0x448] sm:$0xff]  ;;  %v3776_v34 = vpack.c.bf16 %v235_v29, %v145_v28  ;;  %v234_v36 = vld [vmem:[#allocation5 + $0x2e0] sm:$0xff]  ;;  %v188_v37 = vld [vmem:[#allocation5 + $0x170] sm:$0xff] }
  0x41   :  { %v3952_v38 = vpack.c.bf16 %v279_v31, %v189_v30  ;;  %v278_v39 = vld [vmem:[#allocation5 + $0x440] sm:$0xff]  ;;  %v325_v40 = vld [vmem:[#allocation5 + $0x5b8] sm:$0xff]  ;;  %v415_v41 = vld [vmem:[#allocation5 + $0x888] sm:$0xff]  ;;  %v3778_v45 = vpack.c.bf16 %v234_v36, %v144_v35 }
  0x42   :  { %v369_v42 = vld [vmem:[#allocation5 + $0x718] sm:$0xff]  ;;  %v459_v43 = vld [vmem:[#allocation5 + $0x9e8] sm:$0xff]  ;;  %v52_v44 = vld [vmem:[#allocation2] sm:$0xff]  ;;  %v3954_v47 = vpack.c.bf16 %v278_v39, %v188_v37  ;;  %v3780_v48 = vpack.c.bf16 %v415_v41, %v325_v40 }
  0x43   :  { %v96_v46 = vld [vmem:[#allocation2 + $0x160] sm:$0xff]  ;;  %v3956_v49 = vpack.c.bf16 %v459_v43, %v369_v42  ;;  %v55_v50 = vld [vmem:[#allocation2 + $0x18] sm:$0xff]  ;;  %v414_v53 = vld [vmem:[#allocation5 + $0x880] sm:$0xff] }
  0x44   :  { %3775 = vmatpush1.bf16.xpose.msra.mxu1 %v3774_v24  ;;  %v99_v51 = vld [vmem:[#allocation2 + $0x178] sm:$0xff]  ;;  %v324_v52 = vld [vmem:[#allocation5 + $0x5b0] sm:$0xff]  ;;  %v458_v55 = vld [vmem:[#allocation5 + $0x9e0] sm:$0xff] }
  0x45   :  { %3951 = vmatpush1.bf16.xpose.msra.mxu0 %v3950_v25  ;;  %607 = vmatprep.subr.mxu1 %v503_v26  ;;  %v368_v54 = vld [vmem:[#allocation5 + $0x710] sm:$0xff]  ;;  %v3782_v56 = vpack.c.bf16 %v414_v53, %v324_v52  ;;  %v505_v58 = vld [vmem:[#allocation5 + $0xb58] sm:$0xff]  ;;  %v147_v60 = vld [vmem:[#allocation5 + $0x28] sm:$0xff] }
  0x46   :  { %2147 = vmatprep.subr.mxu0 %v547_v27  ;;  %v3958_v57 = vpack.c.bf16 %v458_v55, %v368_v54  ;;  %v549_v59 = vld [vmem:[#allocation5 + $0xcb8] sm:$0xff]  ;;  %v191_v62 = vld [vmem:[#allocation5 + $0x188] sm:$0xff]  ;;  %v504_v0 = vld [vmem:[#allocation5 + $0xb50] sm:$0xff] }
  0x47   :  { %v237_v61 = vld [vmem:[#allocation5 + $0x2f8] sm:$0xff]  ;;  %v548_v1 = vld [vmem:[#allocation5 + $0xcb0] sm:$0xff]  ;;  %v146_v3 = vld [vmem:[#allocation5 + $0x20] sm:$0xff] }
  0x48   :  { %v281_v63 = vld [vmem:[#allocation5 + $0x458] sm:$0xff]  ;;  %v3784_v2 = vpack.c.bf16 %v237_v61, %v147_v60  ;;  %v236_v4 = vld [vmem:[#allocation5 + $0x2f0] sm:$0xff]  ;;  %v190_v5 = vld [vmem:[#allocation5 + $0x180] sm:$0xff] }
  0x49   :  { %v3960_v6 = vpack.c.bf16 %v281_v63, %v191_v62  ;;  %v280_v7 = vld [vmem:[#allocation5 + $0x450] sm:$0xff]  ;;  %v327_v8 = vld [vmem:[#allocation5 + $0x5c8] sm:$0xff]  ;;  %v417_v9 = vld [vmem:[#allocation5 + $0x898] sm:$0xff]  ;;  %v3786_v13 = vpack.c.bf16 %v236_v4, %v146_v3 }
  0x4a   :  { %v371_v10 = vld [vmem:[#allocation5 + $0x728] sm:$0xff]  ;;  %v461_v11 = vld [vmem:[#allocation5 + $0x9f8] sm:$0xff]  ;;  %v54_v12 = vld [vmem:[#allocation2 + $0x10] sm:$0xff]  ;;  %v3962_v15 = vpack.c.bf16 %v280_v7, %v190_v5  ;;  %v3788_v16 = vpack.c.bf16 %v417_v9, %v327_v8 }
  0x4b   :  { %v98_v14 = vld [vmem:[#allocation2 + $0x170] sm:$0xff]  ;;  %v3964_v17 = vpack.c.bf16 %v461_v11, %v371_v10  ;;  %v57_v18 = vld [vmem:[#allocation2 + $0x28] sm:$0xff]  ;;  %v416_v21 = vld [vmem:[#allocation5 + $0x890] sm:$0xff] }
  0x4c   :  { %608 = vmatpush1.xpose.msra.mxu1 %v502_v32  ;;  %v101_v19 = vld [vmem:[#allocation2 + $0x188] sm:$0xff]  ;;  %v326_v20 = vld [vmem:[#allocation5 + $0x5c0] sm:$0xff]  ;;  %v460_v23 = vld [vmem:[#allocation5 + $0x9f0] sm:$0xff] }
  0x4d   :  { %2148 = vmatpush1.xpose.msra.mxu0 %v546_v33  ;;  %3777 = vmatprep.subr.bf16.mxu1 %v3776_v34  ;;  %v370_v22 = vld [vmem:[#allocation5 + $0x720] sm:$0xff]  ;;  %v3790_v24 = vpack.c.bf16 %v416_v21, %v326_v20  ;;  %v507_v26 = vld [vmem:[#allocation5 + $0xb68] sm:$0xff]  ;;  %v149_v28 = vld [vmem:[#allocation5 + $0x38] sm:$0xff] }
  0x4e   :  { %3953 = vmatprep.subr.bf16.mxu0 %v3952_v38  ;;  %v3966_v25 = vpack.c.bf16 %v460_v23, %v370_v22  ;;  %v551_v27 = vld [vmem:[#allocation5 + $0xcc8] sm:$0xff]  ;;  %v193_v30 = vld [vmem:[#allocation5 + $0x198] sm:$0xff]  ;;  %v506_v32 = vld [vmem:[#allocation5 + $0xb60] sm:$0xff] }
  0x4f   :  { %664 = vmatmul.mubr.f32.vlgmr.msra.gmra.mrb[0].mxu1 %v52_v44  ;;  %v239_v29 = vld [vmem:[#allocation5 + $0x308] sm:$0xff]  ;;  %v550_v33 = vld [vmem:[#allocation5 + $0xcc0] sm:$0xff]  ;;  %v148_v35 = vld [vmem:[#allocation5 + $0x30] sm:$0xff] }
  0x50   :  { %3779 = vmatpush1.bf16.xpose.msra.mxu1 %v3778_v45  ;;  %2204 = vmatmul.mubr.f32.vlgmr.msra.gmra.mrb[0].mxu0 %v96_v46  ;;  %v283_v31 = vld [vmem:[#allocation5 + $0x468] sm:$0xff]  ;;  %v3792_v34 = vpack.c.bf16 %v239_v29, %v149_v28  ;;  %v238_v36 = vld [vmem:[#allocation5 + $0x300] sm:$0xff]  ;;  %v192_v37 = vld [vmem:[#allocation5 + $0x190] sm:$0xff] }
  0x51   :  { %3955 = vmatpush1.bf16.xpose.msra.mxu0 %v3954_v47  ;;  %3781 = vmatprep.subr.bf16.mxu1 %v3780_v48  ;;  %v3968_v38 = vpack.c.bf16 %v283_v31, %v193_v30  ;;  %v282_v39 = vld [vmem:[#allocation5 + $0x460] sm:$0xff]  ;;  %v329_v40 = vld [vmem:[#allocation5 + $0x5d8] sm:$0xff]  ;;  %v419_v41 = vld [vmem:[#allocation5 + $0x8a8] sm:$0xff]  ;;  %v3794_v45 = vpack.c.bf16 %v238_v36, %v148_v35 }
  0x52   :  { %3957 = vmatprep.subr.bf16.mxu0 %v3956_v49  ;;  %733 = vmatprep.mubr.f32.mxu1 %v55_v50  ;;  %v373_v42 = vld [vmem:[#allocation5 + $0x738] sm:$0xff]  ;;  %v463_v43 = vld [vmem:[#allocation5 + $0xa08] sm:$0xff]  ;;  %v56_v44 = vld [vmem:[#allocation2 + $0x20] sm:$0xff]  ;;  %v3970_v47 = vpack.c.bf16 %v282_v39, %v192_v37  ;;  %v3796_v48 = vpack.c.bf16 %v419_v41, %v329_v40 }
  0x53   :  { %2273 = vmatprep.mubr.f32.mxu0 %v99_v51  ;;  %v100_v46 = vld [vmem:[#allocation2 + $0x180] sm:$0xff]  ;;  %v3972_v49 = vpack.c.bf16 %v463_v43, %v373_v42  ;;  %v59_v50 = vld [vmem:[#allocation2 + $0x38] sm:$0xff]  ;;  %v418_v53 = vld [vmem:[#allocation5 + $0x8a0] sm:$0xff] }
  0x54   :  { %v103_v51 = vld [vmem:[#allocation2 + $0x198] sm:$0xff]  ;;  %v328_v52 = vld [vmem:[#allocation5 + $0x5d0] sm:$0xff]  ;;  %v462_v55 = vld [vmem:[#allocation5 + $0xa00] sm:$0xff] }
  0x55   :  { %v372_v54 = vld [vmem:[#allocation5 + $0x730] sm:$0xff]  ;;  %v151_v60 = vld [vmem:[#allocation5 + $0x48] sm:$0xff]  ;;  %v241_v61 = vld [vmem:[#allocation5 + $0x318] sm:$0xff] }
  0x56   :  { %v195_v62 = vld [vmem:[#allocation5 + $0x1a8] sm:$0xff]  ;;  %v285_v63 = vld [vmem:[#allocation5 + $0x478] sm:$0xff]  ;;  %v150_v3 = vld [vmem:[#allocation5 + $0x40] sm:$0xff] }
  0x57   :  { %v240_v4 = vld [vmem:[#allocation5 + $0x310] sm:$0xff]  ;;  %v194_v5 = vld [vmem:[#allocation5 + $0x1a0] sm:$0xff]  ;;  %v331_v8 = vld [vmem:[#allocation5 + $0x5e8] sm:$0xff] }
  0x58   :  { %3783 = vmatpush1.bf16.xpose.msra.mxu1 %v3782_v56  ;;  %v3798_v56 = vpack.c.bf16 %v418_v53, %v328_v52  ;;  %v284_v7 = vld [vmem:[#allocation5 + $0x470] sm:$0xff]  ;;  %v421_v9 = vld [vmem:[#allocation5 + $0x8b8] sm:$0xff]  ;;  %v375_v10 = vld [vmem:[#allocation5 + $0x748] sm:$0xff] }
  0x59   :  { %3959 = vmatpush1.bf16.xpose.msra.mxu0 %v3958_v57  ;;  %677 = vmatprep.subr.mxu1 %v505_v58  ;;  %v3974_v57 = vpack.c.bf16 %v462_v55, %v372_v54  ;;  %v509_v58 = vld [vmem:[#allocation5 + $0xb78] sm:$0xff]  ;;  %v330_v20 = vld [vmem:[#allocation5 + $0x5e0] sm:$0xff]  ;;  %v420_v21 = vld [vmem:[#allocation5 + $0x8b0] sm:$0xff] }
  0x5a   :  { %2217 = vmatprep.subr.mxu0 %v549_v59  ;;  %v553_v59 = vld [vmem:[#allocation5 + $0xcd8] sm:$0xff]  ;;  %v374_v22 = vld [vmem:[#allocation5 + $0x740] sm:$0xff]  ;;  %v464_v23 = vld [vmem:[#allocation5 + $0xa10] sm:$0xff] }
  0x5b   :  { %v465_v11 = vld [vmem:[#allocation5 + $0xa18] sm:$0xff]  ;;  %v243_v29 = vld [vmem:[#allocation5 + $0x328] sm:$0xff]  ;;  %v152_v35 = vld [vmem:[#allocation5 + $0x50] sm:$0xff] }
  0x5c   :  { %v153_v28 = vld [vmem:[#allocation5 + $0x58] sm:$0xff]  ;;  %v287_v31 = vld [vmem:[#allocation5 + $0x488] sm:$0xff]  ;;  %v242_v36 = vld [vmem:[#allocation5 + $0x320] sm:$0xff] }
  0x5d   :  { %v197_v30 = vld [vmem:[#allocation5 + $0x1b8] sm:$0xff]  ;;  %v196_v37 = vld [vmem:[#allocation5 + $0x1b0] sm:$0xff]  ;;  %v286_v39 = vld [vmem:[#allocation5 + $0x480] sm:$0xff] }
  0x5e   :  { %v333_v40 = vld [vmem:[#allocation5 + $0x5f8] sm:$0xff]  ;;  %v423_v41 = vld [vmem:[#allocation5 + $0x8c8] sm:$0xff]  ;;  %v332_v52 = vld [vmem:[#allocation5 + $0x5f0] sm:$0xff] }
  0x5f   :  { %v377_v42 = vld [vmem:[#allocation5 + $0x758] sm:$0xff]  ;;  %v467_v43 = vld [vmem:[#allocation5 + $0xa28] sm:$0xff]  ;;  %v422_v53 = vld [vmem:[#allocation5 + $0x8c0] sm:$0xff] }
  0x60   :  { %678 = vmatpush1.xpose.msra.mxu1 %v504_v0  ;;  %v508_v0 = vld [vmem:[#allocation5 + $0xb70] sm:$0xff]  ;;  %v466_v55 = vld [vmem:[#allocation5 + $0xa20] sm:$0xff] }
  0x61   :  { %2218 = vmatpush1.xpose.msra.mxu0 %v548_v1  ;;  %3785 = vmatprep.subr.bf16.mxu1 %v3784_v2  ;;  %v552_v1 = vld [vmem:[#allocation5 + $0xcd0] sm:$0xff]  ;;  %v3800_v2 = vpack.c.bf16 %v241_v61, %v151_v60  ;;  %v155_v60 = vld [vmem:[#allocation5 + $0x68] sm:$0xff]  ;;  %v245_v61 = vld [vmem:[#allocation5 + $0x338] sm:$0xff] }
  0x62   :  { %3961 = vmatprep.subr.bf16.mxu0 %v3960_v6  ;;  %v3976_v6 = vpack.c.bf16 %v285_v63, %v195_v62  ;;  %v376_v54 = vld [vmem:[#allocation5 + $0x750] sm:$0xff]  ;;  %v199_v62 = vld [vmem:[#allocation5 + $0x1c8] sm:$0xff]  ;;  %v289_v63 = vld [vmem:[#allocation5 + $0x498] sm:$0xff] }
  0x63   :  { %734 = vmatmul.mubr.f32.vlgmr.msra.gmra.mrb[0].mxu1 %v54_v12  ;;  %v58_v12 = vld [vmem:[#allocation2 + $0x30] sm:$0xff] }
  0x64   :  { %3787 = vmatpush1.bf16.xpose.msra.mxu1 %v3786_v13  ;;  %2274 = vmatmul.mubr.f32.vlgmr.msra.gmra.mrb[0].mxu0 %v98_v14  ;;  %v3802_v13 = vpack.c.bf16 %v240_v4, %v150_v3  ;;  %v102_v14 = vld [vmem:[#allocation2 + $0x190] sm:$0xff]  ;;  %v244_v4 = vld [vmem:[#allocation5 + $0x330] sm:$0xff] }
  0x65   :  { %3963 = vmatpush1.bf16.xpose.msra.mxu0 %v3962_v15  ;;  %3789 = vmatprep.subr.bf16.mxu1 %v3788_v16  ;;  %v3978_v15 = vpack.c.bf16 %v284_v7, %v194_v5  ;;  %v3804_v16 = vpack.c.bf16 %v421_v9, %v331_v8  ;;  %v154_v3 = vld [vmem:[#allocation5 + $0x60] sm:$0xff]  ;;  %v288_v7 = vld [vmem:[#allocation5 + $0x490] sm:$0xff]  ;;  %v335_v8 = vld [vmem:[#allocation5 + $0x608] sm:$0xff] }
  0x66   :  { %3965 = vmatprep.subr.bf16.mxu0 %v3964_v17  ;;  %803 = vmatprep.mubr.f32.mxu1 %v57_v18  ;;  %v3980_v17 = vpack.c.bf16 %v465_v11, %v375_v10  ;;  %v61_v18 = vld [vmem:[#allocation2 + $0x48] sm:$0xff]  ;;  %v198_v5 = vld [vmem:[#allocation5 + $0x1c0] sm:$0xff]  ;;  %v379_v10 = vld [vmem:[#allocation5 + $0x768] sm:$0xff] }
  0x67   :  { %2343 = vmatprep.mubr.f32.mxu0 %v101_v19  ;;  %v105_v19 = vld [vmem:[#allocation2 + $0x1a8] sm:$0xff] }
  0x68   :  { %v425_v9 = vld [vmem:[#allocation5 + $0x8d8] sm:$0xff] }
  0x69   :  { %v469_v11 = vld [vmem:[#allocation5 + $0xa38] sm:$0xff] }
  0x6c   :  { %3791 = vmatpush1.bf16.xpose.msra.mxu1 %v3790_v24  ;;  %v3806_v24 = vpack.c.bf16 %v420_v21, %v330_v20  ;;  %v334_v20 = vld [vmem:[#allocation5 + $0x600] sm:$0xff]  ;;  %v424_v21 = vld [vmem:[#allocation5 + $0x8d0] sm:$0xff] }
  0x6d   :  { %3967 = vmatpush1.bf16.xpose.msra.mxu0 %v3966_v25  ;;  %747 = vmatprep.subr.mxu1 %v507_v26  ;;  %v3982_v25 = vpack.c.bf16 %v464_v23, %v374_v22  ;;  %v511_v26 = vld [vmem:[#allocation5 + $0xb88] sm:$0xff]  ;;  %v378_v22 = vld [vmem:[#allocation5 + $0x760] sm:$0xff]  ;;  %v468_v23 = vld [vmem:[#allocation5 + $0xa30] sm:$0xff] }
  0x6e   :  { %2287 = vmatprep.subr.mxu0 %v551_v27  ;;  %v555_v27 = vld [vmem:[#allocation5 + $0xce8] sm:$0xff] }
  0x74   :  { %748 = vmatpush1.xpose.msra.mxu1 %v506_v32  ;;  %v510_v32 = vld [vmem:[#allocation5 + $0xb80] sm:$0xff] }
  0x75   :  { %2288 = vmatpush1.xpose.msra.mxu0 %v550_v33  ;;  %3793 = vmatprep.subr.bf16.mxu1 %v3792_v34  ;;  %v554_v33 = vld [vmem:[#allocation5 + $0xce0] sm:$0xff]  ;;  %v3808_v34 = vpack.c.bf16 %v243_v29, %v153_v28  ;;  %v157_v28 = vld [vmem:[#allocation5 + $0x78] sm:$0xff]  ;;  %v247_v29 = vld [vmem:[#allocation5 + $0x348] sm:$0xff] }
  0x76   :  { %3969 = vmatprep.subr.bf16.mxu0 %v3968_v38  ;;  %v3984_v38 = vpack.c.bf16 %v287_v31, %v197_v30  ;;  %v201_v30 = vld [vmem:[#allocation5 + $0x1d8] sm:$0xff]  ;;  %v291_v31 = vld [vmem:[#allocation5 + $0x4a8] sm:$0xff] }
  0x77   :  { %804 = vmatmul.mubr.f32.vlgmr.msra.gmra.mrb[0].mxu1 %v56_v44  ;;  %v60_v44 = vld [vmem:[#allocation2 + $0x40] sm:$0xff] }
  0x78   :  { %3795 = vmatpush1.bf16.xpose.msra.mxu1 %v3794_v45  ;;  %2344 = vmatmul.mubr.f32.vlgmr.msra.gmra.mrb[0].mxu0 %v100_v46  ;;  %v3810_v45 = vpack.c.bf16 %v242_v36, %v152_v35  ;;  %v104_v46 = vld [vmem:[#allocation2 + $0x1a0] sm:$0xff]  ;;  %v246_v36 = vld [vmem:[#allocation5 + $0x340] sm:$0xff] }
  0x79   :  { %3971 = vmatpush1.bf16.xpose.msra.mxu0 %v3970_v47  ;;  %3797 = vmatprep.subr.bf16.mxu1 %v3796_v48  ;;  %v3986_v47 = vpack.c.bf16 %v286_v39, %v196_v37  ;;  %v3812_v48 = vpack.c.bf16 %v423_v41, %v333_v40  ;;  %v156_v35 = vld [vmem:[#allocation5 + $0x70] sm:$0xff]  ;;  %v290_v39 = vld [vmem:[#allocation5 + $0x4a0] sm:$0xff]  ;;  %v337_v40 = vld [vmem:[#allocation5 + $0x618] sm:$0xff] }
  0x7a   :  { %3973 = vmatprep.subr.bf16.mxu0 %v3972_v49  ;;  %873 = vmatprep.mubr.f32.mxu1 %v59_v50  ;;  %v3988_v49 = vpack.c.bf16 %v467_v43, %v377_v42  ;;  %v63_v50 = vld [vmem:[#allocation2 + $0x58] sm:$0xff]  ;;  %v200_v37 = vld [vmem:[#allocation5 + $0x1d0] sm:$0xff]  ;;  %v381_v42 = vld [vmem:[#allocation5 + $0x778] sm:$0xff] }
  0x7b   :  { %2413 = vmatprep.mubr.f32.mxu0 %v103_v51  ;;  %v107_v51 = vld [vmem:[#allocation2 + $0x1b8] sm:$0xff] }
  0x7c   :  { %v427_v41 = vld [vmem:[#allocation5 + $0x8e8] sm:$0xff] }
  0x7d   :  { %v471_v43 = vld [vmem:[#allocation5 + $0xa48] sm:$0xff] }
  0x80   :  { %3799 = vmatpush1.bf16.xpose.msra.mxu1 %v3798_v56  ;;  %v3814_v56 = vpack.c.bf16 %v422_v53, %v332_v52  ;;  %v336_v52 = vld [vmem:[#allocation5 + $0x610] sm:$0xff]  ;;  %v426_v53 = vld [vmem:[#allocation5 + $0x8e0] sm:$0xff] }
  0x81   :  { %3975 = vmatpush1.bf16.xpose.msra.mxu0 %v3974_v57  ;;  %817 = vmatprep.subr.mxu1 %v509_v58  ;;  %v3990_v57 = vpack.c.bf16 %v466_v55, %v376_v54  ;;  %v513_v58 = vld [vmem:[#allocation5 + $0xb98] sm:$0xff]  ;;  %v380_v54 = vld [vmem:[#allocation5 + $0x770] sm:$0xff]  ;;  %v470_v55 = vld [vmem:[#allocation5 + $0xa40] sm:$0xff] }
  0x82   :  { %2357 = vmatprep.subr.mxu0 %v553_v59  ;;  %v557_v59 = vld [vmem:[#allocation5 + $0xcf8] sm:$0xff] }
  0x88   :  { %818 = vmatpush1.xpose.msra.mxu1 %v508_v0  ;;  %v512_v0 = vld [vmem:[#allocation5 + $0xb90] sm:$0xff] }
  0x89   :  { %2358 = vmatpush1.xpose.msra.mxu0 %v552_v1  ;;  %3801 = vmatprep.subr.bf16.mxu1 %v3800_v2  ;;  %v556_v1 = vld [vmem:[#allocation5 + $0xcf0] sm:$0xff]  ;;  %v3816_v2 = vpack.c.bf16 %v245_v61, %v155_v60  ;;  %v159_v60 = vld [vmem:[#allocation5 + $0x88] sm:$0xff]  ;;  %v249_v61 = vld [vmem:[#allocation5 + $0x358] sm:$0xff] }
  0x8a   :  { %3977 = vmatprep.subr.bf16.mxu0 %v3976_v6  ;;  %v3992_v6 = vpack.c.bf16 %v289_v63, %v199_v62  ;;  %v203_v62 = vld [vmem:[#allocation5 + $0x1e8] sm:$0xff]  ;;  %v293_v63 = vld [vmem:[#allocation5 + $0x4b8] sm:$0xff] }
  0x8b   :  { %874 = vmatmul.mubr.f32.vlgmr.msra.gmra.mrb[0].mxu1 %v58_v12  ;;  %v62_v12 = vld [vmem:[#allocation2 + $0x50] sm:$0xff] }
  0x8c   :  { %3803 = vmatpush1.bf16.xpose.msra.mxu1 %v3802_v13  ;;  %2414 = vmatmul.mubr.f32.vlgmr.msra.gmra.mrb[0].mxu0 %v102_v14  ;;  %v3818_v13 = vpack.c.bf16 %v244_v4, %v154_v3  ;;  %v106_v14 = vld [vmem:[#allocation2 + $0x1b0] sm:$0xff]  ;;  %v248_v4 = vld [vmem:[#allocation5 + $0x350] sm:$0xff] }
  0x8d   :  { %3979 = vmatpush1.bf16.xpose.msra.mxu0 %v3978_v15  ;;  %3805 = vmatprep.subr.bf16.mxu1 %v3804_v16  ;;  %v3994_v15 = vpack.c.bf16 %v288_v7, %v198_v5  ;;  %v3820_v16 = vpack.c.bf16 %v425_v9, %v335_v8  ;;  %v158_v3 = vld [vmem:[#allocation5 + $0x80] sm:$0xff]  ;;  %v292_v7 = vld [vmem:[#allocation5 + $0x4b0] sm:$0xff]  ;;  %v339_v8 = vld [vmem:[#allocation5 + $0x628] sm:$0xff] }
  0x8e   :  { %3981 = vmatprep.subr.bf16.mxu0 %v3980_v17  ;;  %943 = vmatprep.mubr.f32.mxu1 %v61_v18  ;;  %v3996_v17 = vpack.c.bf16 %v469_v11, %v379_v10  ;;  %v65_v18 = vld [vmem:[#allocation2 + $0x68] sm:$0xff]  ;;  %v202_v5 = vld [vmem:[#allocation5 + $0x1e0] sm:$0xff]  ;;  %v383_v10 = vld [vmem:[#allocation5 + $0x788] sm:$0xff] }
  0x8f   :  { %2483 = vmatprep.mubr.f32.mxu0 %v105_v19  ;;  %v109_v19 = vld [vmem:[#allocation2 + $0x1c8] sm:$0xff] }
  0x90   :  { %v429_v9 = vld [vmem:[#allocation5 + $0x8f8] sm:$0xff] }
  0x91   :  { %v473_v11 = vld [vmem:[#allocation5 + $0xa58] sm:$0xff] }
  0x94   :  { %3807 = vmatpush1.bf16.xpose.msra.mxu1 %v3806_v24  ;;  %v3822_v24 = vpack.c.bf16 %v424_v21, %v334_v20  ;;  %v338_v20 = vld [vmem:[#allocation5 + $0x620] sm:$0xff]  ;;  %v428_v21 = vld [vmem:[#allocation5 + $0x8f0] sm:$0xff] }
  0x95   :  { %3983 = vmatpush1.bf16.xpose.msra.mxu0 %v3982_v25  ;;  %887 = vmatprep.subr.mxu1 %v511_v26  ;;  %v3998_v25 = vpack.c.bf16 %v468_v23, %v378_v22  ;;  %v515_v26 = vld [vmem:[#allocation5 + $0xba8] sm:$0xff]  ;;  %v382_v22 = vld [vmem:[#allocation5 + $0x780] sm:$0xff]  ;;  %v472_v23 = vld [vmem:[#allocation5 + $0xa50] sm:$0xff] }
  0x96   :  { %2427 = vmatprep.subr.mxu0 %v555_v27  ;;  %v559_v27 = vld [vmem:[#allocation5 + $0xd08] sm:$0xff] }
  0x9c   :  { %888 = vmatpush1.xpose.msra.mxu1 %v510_v32  ;;  %v514_v32 = vld [vmem:[#allocation5 + $0xba0] sm:$0xff] }
  0x9d   :  { %2428 = vmatpush1.xpose.msra.mxu0 %v554_v33  ;;  %3809 = vmatprep.subr.bf16.mxu1 %v3808_v34  ;;  %v558_v33 = vld [vmem:[#allocation5 + $0xd00] sm:$0xff]  ;;  %v3824_v34 = vpack.c.bf16 %v247_v29, %v157_v28  ;;  %v161_v28 = vld [vmem:[#allocation5 + $0x98] sm:$0xff]  ;;  %v251_v29 = vld [vmem:[#allocation5 + $0x368] sm:$0xff] }
  0x9e   :  { %3985 = vmatprep.subr.bf16.mxu0 %v3984_v38  ;;  %v4000_v38 = vpack.c.bf16 %v291_v31, %v201_v30  ;;  %v205_v30 = vld [vmem:[#allocation5 + $0x1f8] sm:$0xff]  ;;  %v295_v31 = vld [vmem:[#allocation5 + $0x4c8] sm:$0xff] }
  0x9f   :  { %944 = vmatmul.mubr.f32.vlgmr.msra.gmra.mrb[0].mxu1 %v60_v44  ;;  %v64_v44 = vld [vmem:[#allocation2 + $0x60] sm:$0xff] }
  0xa0   :  { %3811 = vmatpush1.bf16.xpose.msra.mxu1 %v3810_v45  ;;  %2484 = vmatmul.mubr.f32.vlgmr.msra.gmra.mrb[0].mxu0 %v104_v46  ;;  %v3826_v45 = vpack.c.bf16 %v246_v36, %v156_v35  ;;  %v108_v46 = vld [vmem:[#allocation2 + $0x1c0] sm:$0xff]  ;;  %v250_v36 = vld [vmem:[#allocation5 + $0x360] sm:$0xff] }
  0xa1   :  { %3987 = vmatpush1.bf16.xpose.msra.mxu0 %v3986_v47  ;;  %3813 = vmatprep.subr.bf16.mxu1 %v3812_v48  ;;  %v4002_v47 = vpack.c.bf16 %v290_v39, %v200_v37  ;;  %v3828_v48 = vpack.c.bf16 %v427_v41, %v337_v40  ;;  %v160_v35 = vld [vmem:[#allocation5 + $0x90] sm:$0xff]  ;;  %v294_v39 = vld [vmem:[#allocation5 + $0x4c0] sm:$0xff]  ;;  %v341_v40 = vld [vmem:[#allocation5 + $0x638] sm:$0xff] }
  0xa2   :  { %3989 = vmatprep.subr.bf16.mxu0 %v3988_v49  ;;  %1013 = vmatprep.mubr.f32.mxu1 %v63_v50  ;;  %v4004_v49 = vpack.c.bf16 %v471_v43, %v381_v42  ;;  %v67_v50 = vld [vmem:[#allocation2 + $0x78] sm:$0xff]  ;;  %v204_v37 = vld [vmem:[#allocation5 + $0x1f0] sm:$0xff]  ;;  %v385_v42 = vld [vmem:[#allocation5 + $0x798] sm:$0xff] }
  0xa3   :  { %2553 = vmatprep.mubr.f32.mxu0 %v107_v51  ;;  %v111_v51 = vld [vmem:[#allocation2 + $0x1d8] sm:$0xff] }
  0xa4   :  { %v431_v41 = vld [vmem:[#allocation5 + $0x908] sm:$0xff] }
  0xa5   :  { %v475_v43 = vld [vmem:[#allocation5 + $0xa68] sm:$0xff] }
  0xa8   :  { %3815 = vmatpush1.bf16.xpose.msra.mxu1 %v3814_v56  ;;  %v3830_v56 = vpack.c.bf16 %v426_v53, %v336_v52  ;;  %v340_v52 = vld [vmem:[#allocation5 + $0x630] sm:$0xff]  ;;  %v430_v53 = vld [vmem:[#allocation5 + $0x900] sm:$0xff] }
  0xa9   :  { %3991 = vmatpush1.bf16.xpose.msra.mxu0 %v3990_v57  ;;  %957 = vmatprep.subr.mxu1 %v513_v58  ;;  %v4006_v57 = vpack.c.bf16 %v470_v55, %v380_v54  ;;  %v517_v58 = vld [vmem:[#allocation5 + $0xbb8] sm:$0xff]  ;;  %v384_v54 = vld [vmem:[#allocation5 + $0x790] sm:$0xff]  ;;  %v474_v55 = vld [vmem:[#allocation5 + $0xa60] sm:$0xff] }
  0xaa   :  { %2497 = vmatprep.subr.mxu0 %v557_v59  ;;  %v561_v59 = vld [vmem:[#allocation5 + $0xd18] sm:$0xff] }
  0xb0   :  { %958 = vmatpush1.xpose.msra.mxu1 %v512_v0  ;;  %v516_v0 = vld [vmem:[#allocation5 + $0xbb0] sm:$0xff] }
  0xb1   :  { %2498 = vmatpush1.xpose.msra.mxu0 %v556_v1  ;;  %3817 = vmatprep.subr.bf16.mxu1 %v3816_v2  ;;  %v560_v1 = vld [vmem:[#allocation5 + $0xd10] sm:$0xff]  ;;  %v3832_v2 = vpack.c.bf16 %v249_v61, %v159_v60  ;;  %v163_v60 = vld [vmem:[#allocation5 + $0xa8] sm:$0xff]  ;;  %v253_v61 = vld [vmem:[#allocation5 + $0x378] sm:$0xff] }
  0xb2   :  { %3993 = vmatprep.subr.bf16.mxu0 %v3992_v6  ;;  %v4008_v6 = vpack.c.bf16 %v293_v63, %v203_v62  ;;  %v207_v62 = vld [vmem:[#allocation5 + $0x208] sm:$0xff]  ;;  %v297_v63 = vld [vmem:[#allocation5 + $0x4d8] sm:$0xff] }
  0xb3   :  { %1014 = vmatmul.mubr.f32.vlgmr.msra.gmra.mrb[0].mxu1 %v62_v12  ;;  %v66_v12 = vld [vmem:[#allocation2 + $0x70] sm:$0xff] }
  0xb4   :  { %3819 = vmatpush1.bf16.xpose.msra.mxu1 %v3818_v13  ;;  %2554 = vmatmul.mubr.f32.vlgmr.msra.gmra.mrb[0].mxu0 %v106_v14  ;;  %v3834_v13 = vpack.c.bf16 %v248_v4, %v158_v3  ;;  %v110_v14 = vld [vmem:[#allocation2 + $0x1d0] sm:$0xff]  ;;  %v252_v4 = vld [vmem:[#allocation5 + $0x370] sm:$0xff] }
  0xb5   :  { %3995 = vmatpush1.bf16.xpose.msra.mxu0 %v3994_v15  ;;  %3821 = vmatprep.subr.bf16.mxu1 %v3820_v16  ;;  %v4010_v15 = vpack.c.bf16 %v292_v7, %v202_v5  ;;  %v3836_v16 = vpack.c.bf16 %v429_v9, %v339_v8  ;;  %v162_v3 = vld [vmem:[#allocation5 + $0xa0] sm:$0xff]  ;;  %v296_v7 = vld [vmem:[#allocation5 + $0x4d0] sm:$0xff]  ;;  %v343_v8 = vld [vmem:[#allocation5 + $0x648] sm:$0xff] }
  0xb6   :  { %3997 = vmatprep.subr.bf16.mxu0 %v3996_v17  ;;  %1083 = vmatprep.mubr.f32.mxu1 %v65_v18  ;;  %v4012_v17 = vpack.c.bf16 %v473_v11, %v383_v10  ;;  %v69_v18 = vld [vmem:[#allocation2 + $0x88] sm:$0xff]  ;;  %v206_v5 = vld [vmem:[#allocation5 + $0x200] sm:$0xff]  ;;  %v387_v10 = vld [vmem:[#allocation5 + $0x7a8] sm:$0xff] }
  0xb7   :  { %2623 = vmatprep.mubr.f32.mxu0 %v109_v19  ;;  %v113_v19 = vld [vmem:[#allocation2 + $0x1e8] sm:$0xff] }
  0xb8   :  { %v433_v9 = vld [vmem:[#allocation5 + $0x918] sm:$0xff] }
  0xb9   :  { %v477_v11 = vld [vmem:[#allocation5 + $0xa78] sm:$0xff] }
  0xbc   :  { %3823 = vmatpush1.bf16.xpose.msra.mxu1 %v3822_v24  ;;  %v3838_v24 = vpack.c.bf16 %v428_v21, %v338_v20  ;;  %v342_v20 = vld [vmem:[#allocation5 + $0x640] sm:$0xff]  ;;  %v432_v21 = vld [vmem:[#allocation5 + $0x910] sm:$0xff] }
  0xbd   :  { %3999 = vmatpush1.bf16.xpose.msra.mxu0 %v3998_v25  ;;  %1027 = vmatprep.subr.mxu1 %v515_v26  ;;  %v4014_v25 = vpack.c.bf16 %v472_v23, %v382_v22  ;;  %v519_v26 = vld [vmem:[#allocation5 + $0xbc8] sm:$0xff]  ;;  %v386_v22 = vld [vmem:[#allocation5 + $0x7a0] sm:$0xff]  ;;  %v476_v23 = vld [vmem:[#allocation5 + $0xa70] sm:$0xff] }
  0xbe   :  { %2567 = vmatprep.subr.mxu0 %v559_v27  ;;  %v563_v27 = vld [vmem:[#allocation5 + $0xd28] sm:$0xff] }
  0xc4   :  { %1028 = vmatpush1.xpose.msra.mxu1 %v514_v32  ;;  %v518_v32 = vld [vmem:[#allocation5 + $0xbc0] sm:$0xff] }
  0xc5   :  { %2568 = vmatpush1.xpose.msra.mxu0 %v558_v33  ;;  %3825 = vmatprep.subr.bf16.mxu1 %v3824_v34  ;;  %v562_v33 = vld [vmem:[#allocation5 + $0xd20] sm:$0xff]  ;;  %v3840_v34 = vpack.c.bf16 %v251_v29, %v161_v28  ;;  %v165_v28 = vld [vmem:[#allocation5 + $0xb8] sm:$0xff]  ;;  %v255_v29 = vld [vmem:[#allocation5 + $0x388] sm:$0xff] }
  0xc6   :  { %4001 = vmatprep.subr.bf16.mxu0 %v4000_v38  ;;  %v4016_v38 = vpack.c.bf16 %v295_v31, %v205_v30  ;;  %v209_v30 = vld [vmem:[#allocation5 + $0x218] sm:$0xff]  ;;  %v299_v31 = vld [vmem:[#allocation5 + $0x4e8] sm:$0xff] }
  0xc7   :  { %1084 = vmatmul.mubr.f32.vlgmr.msra.gmra.mrb[0].mxu1 %v64_v44  ;;  %v68_v44 = vld [vmem:[#allocation2 + $0x80] sm:$0xff] }
  0xc8   :  { %3827 = vmatpush1.bf16.xpose.msra.mxu1 %v3826_v45  ;;  %2624 = vmatmul.mubr.f32.vlgmr.msra.gmra.mrb[0].mxu0 %v108_v46  ;;  %v3842_v45 = vpack.c.bf16 %v250_v36, %v160_v35  ;;  %v112_v46 = vld [vmem:[#allocation2 + $0x1e0] sm:$0xff]  ;;  %v254_v36 = vld [vmem:[#allocation5 + $0x380] sm:$0xff] }
  0xc9   :  { %4003 = vmatpush1.bf16.xpose.msra.mxu0 %v4002_v47  ;;  %3829 = vmatprep.subr.bf16.mxu1 %v3828_v48  ;;  %v4018_v47 = vpack.c.bf16 %v294_v39, %v204_v37  ;;  %v3844_v48 = vpack.c.bf16 %v431_v41, %v341_v40  ;;  %v164_v35 = vld [vmem:[#allocation5 + $0xb0] sm:$0xff]  ;;  %v298_v39 = vld [vmem:[#allocation5 + $0x4e0] sm:$0xff]  ;;  %v345_v40 = vld [vmem:[#allocation5 + $0x658] sm:$0xff] }
  0xca   :  { %4005 = vmatprep.subr.bf16.mxu0 %v4004_v49  ;;  %1153 = vmatprep.mubr.f32.mxu1 %v67_v50  ;;  %v4020_v49 = vpack.c.bf16 %v475_v43, %v385_v42  ;;  %v71_v50 = vld [vmem:[#allocation2 + $0x98] sm:$0xff]  ;;  %v208_v37 = vld [vmem:[#allocation5 + $0x210] sm:$0xff]  ;;  %v389_v42 = vld [vmem:[#allocation5 + $0x7b8] sm:$0xff] }
  0xcb   :  { %2693 = vmatprep.mubr.f32.mxu0 %v111_v51  ;;  %v115_v51 = vld [vmem:[#allocation2 + $0x1f8] sm:$0xff] }
  0xcc   :  { %v435_v41 = vld [vmem:[#allocation5 + $0x928] sm:$0xff] }
  0xcd   :  { %v479_v43 = vld [vmem:[#allocation5 + $0xa88] sm:$0xff] }
  0xd0   :  { %3831 = vmatpush1.bf16.xpose.msra.mxu1 %v3830_v56  ;;  %v3846_v56 = vpack.c.bf16 %v430_v53, %v340_v52  ;;  %v344_v52 = vld [vmem:[#allocation5 + $0x650] sm:$0xff]  ;;  %v434_v53 = vld [vmem:[#allocation5 + $0x920] sm:$0xff] }
  0xd1   :  { %4007 = vmatpush1.bf16.xpose.msra.mxu0 %v4006_v57  ;;  %1097 = vmatprep.subr.mxu1 %v517_v58  ;;  %v4022_v57 = vpack.c.bf16 %v474_v55, %v384_v54  ;;  %v521_v58 = vld [vmem:[#allocation5 + $0xbd8] sm:$0xff]  ;;  %v388_v54 = vld [vmem:[#allocation5 + $0x7b0] sm:$0xff]  ;;  %v478_v55 = vld [vmem:[#allocation5 + $0xa80] sm:$0xff] }
  0xd2   :  { %2637 = vmatprep.subr.mxu0 %v561_v59  ;;  %v565_v59 = vld [vmem:[#allocation5 + $0xd38] sm:$0xff] }
  0xd8   :  { %1098 = vmatpush1.xpose.msra.mxu1 %v516_v0  ;;  %v520_v0 = vld [vmem:[#allocation5 + $0xbd0] sm:$0xff] }
  0xd9   :  { %2638 = vmatpush1.xpose.msra.mxu0 %v560_v1  ;;  %3833 = vmatprep.subr.bf16.mxu1 %v3832_v2  ;;  %v564_v1 = vld [vmem:[#allocation5 + $0xd30] sm:$0xff]  ;;  %v3848_v2 = vpack.c.bf16 %v253_v61, %v163_v60  ;;  %v167_v60 = vld [vmem:[#allocation5 + $0xc8] sm:$0xff]  ;;  %v257_v61 = vld [vmem:[#allocation5 + $0x398] sm:$0xff] }
  0xda   :  { %4009 = vmatprep.subr.bf16.mxu0 %v4008_v6  ;;  %v4024_v6 = vpack.c.bf16 %v297_v63, %v207_v62  ;;  %v211_v62 = vld [vmem:[#allocation5 + $0x228] sm:$0xff]  ;;  %v301_v63 = vld [vmem:[#allocation5 + $0x4f8] sm:$0xff] }
  0xdb   :  { %1154 = vmatmul.mubr.f32.vlgmr.msra.gmra.mrb[0].mxu1 %v66_v12  ;;  %v70_v12 = vld [vmem:[#allocation2 + $0x90] sm:$0xff] }
  0xdc   :  { %3835 = vmatpush1.bf16.xpose.msra.mxu1 %v3834_v13  ;;  %2694 = vmatmul.mubr.f32.vlgmr.msra.gmra.mrb[0].mxu0 %v110_v14  ;;  %v3850_v13 = vpack.c.bf16 %v252_v4, %v162_v3  ;;  %v114_v14 = vld [vmem:[#allocation2 + $0x1f0] sm:$0xff]  ;;  %v256_v4 = vld [vmem:[#allocation5 + $0x390] sm:$0xff] }
  0xdd   :  { %4011 = vmatpush1.bf16.xpose.msra.mxu0 %v4010_v15  ;;  %3837 = vmatprep.subr.bf16.mxu1 %v3836_v16  ;;  %v4026_v15 = vpack.c.bf16 %v296_v7, %v206_v5  ;;  %v3852_v16 = vpack.c.bf16 %v433_v9, %v343_v8  ;;  %v166_v3 = vld [vmem:[#allocation5 + $0xc0] sm:$0xff]  ;;  %v300_v7 = vld [vmem:[#allocation5 + $0x4f0] sm:$0xff]  ;;  %v347_v8 = vld [vmem:[#allocation5 + $0x668] sm:$0xff] }
  0xde   :  { %4013 = vmatprep.subr.bf16.mxu0 %v4012_v17  ;;  %1223 = vmatprep.mubr.f32.mxu1 %v69_v18  ;;  %v4028_v17 = vpack.c.bf16 %v477_v11, %v387_v10  ;;  %v73_v18 = vld [vmem:[#allocation2 + $0xa8] sm:$0xff]  ;;  %v210_v5 = vld [vmem:[#allocation5 + $0x220] sm:$0xff]  ;;  %v391_v10 = vld [vmem:[#allocation5 + $0x7c8] sm:$0xff] }
  0xdf   :  { %2763 = vmatprep.mubr.f32.mxu0 %v113_v19  ;;  %v117_v19 = vld [vmem:[#allocation2 + $0x208] sm:$0xff] }
  0xe0   :  { %v437_v9 = vld [vmem:[#allocation5 + $0x938] sm:$0xff] }
  0xe1   :  { %v481_v11 = vld [vmem:[#allocation5 + $0xa98] sm:$0xff] }
  0xe4   :  { %3839 = vmatpush1.bf16.xpose.msra.mxu1 %v3838_v24  ;;  %v3854_v24 = vpack.c.bf16 %v432_v21, %v342_v20  ;;  %v346_v20 = vld [vmem:[#allocation5 + $0x660] sm:$0xff]  ;;  %v436_v21 = vld [vmem:[#allocation5 + $0x930] sm:$0xff] }
  0xe5   :  { %4015 = vmatpush1.bf16.xpose.msra.mxu0 %v4014_v25  ;;  %1167 = vmatprep.subr.mxu1 %v519_v26  ;;  %v4030_v25 = vpack.c.bf16 %v476_v23, %v386_v22  ;;  %v523_v26 = vld [vmem:[#allocation5 + $0xbe8] sm:$0xff]  ;;  %v390_v22 = vld [vmem:[#allocation5 + $0x7c0] sm:$0xff]  ;;  %v480_v23 = vld [vmem:[#allocation5 + $0xa90] sm:$0xff] }
  0xe6   :  { %2707 = vmatprep.subr.mxu0 %v563_v27  ;;  %v567_v27 = vld [vmem:[#allocation5 + $0xd48] sm:$0xff] }
  0xec   :  { %1168 = vmatpush1.xpose.msra.mxu1 %v518_v32  ;;  %v522_v32 = vld [vmem:[#allocation5 + $0xbe0] sm:$0xff] }
  0xed   :  { %2708 = vmatpush1.xpose.msra.mxu0 %v562_v33  ;;  %3841 = vmatprep.subr.bf16.mxu1 %v3840_v34  ;;  %v566_v33 = vld [vmem:[#allocation5 + $0xd40] sm:$0xff]  ;;  %v3856_v34 = vpack.c.bf16 %v255_v29, %v165_v28  ;;  %v169_v28 = vld [vmem:[#allocation5 + $0xd8] sm:$0xff]  ;;  %v259_v29 = vld [vmem:[#allocation5 + $0x3a8] sm:$0xff] }
  0xee   :  { %4017 = vmatprep.subr.bf16.mxu0 %v4016_v38  ;;  %v4032_v38 = vpack.c.bf16 %v299_v31, %v209_v30  ;;  %v213_v30 = vld [vmem:[#allocation5 + $0x238] sm:$0xff]  ;;  %v303_v31 = vld [vmem:[#allocation5 + $0x508] sm:$0xff] }
  0xef   :  { %1224 = vmatmul.mubr.f32.vlgmr.msra.gmra.mrb[0].mxu1 %v68_v44  ;;  %v72_v44 = vld [vmem:[#allocation2 + $0xa0] sm:$0xff] }
  0xf0   :  { %3843 = vmatpush1.bf16.xpose.msra.mxu1 %v3842_v45  ;;  %2764 = vmatmul.mubr.f32.vlgmr.msra.gmra.mrb[0].mxu0 %v112_v46  ;;  %v3858_v45 = vpack.c.bf16 %v254_v36, %v164_v35  ;;  %v116_v46 = vld [vmem:[#allocation2 + $0x200] sm:$0xff]  ;;  %v258_v36 = vld [vmem:[#allocation5 + $0x3a0] sm:$0xff] }
  0xf1   :  { %4019 = vmatpush1.bf16.xpose.msra.mxu0 %v4018_v47  ;;  %3845 = vmatprep.subr.bf16.mxu1 %v3844_v48  ;;  %v4034_v47 = vpack.c.bf16 %v298_v39, %v208_v37  ;;  %v3860_v48 = vpack.c.bf16 %v435_v41, %v345_v40  ;;  %v168_v35 = vld [vmem:[#allocation5 + $0xd0] sm:$0xff]  ;;  %v302_v39 = vld [vmem:[#allocation5 + $0x500] sm:$0xff]  ;;  %v349_v40 = vld [vmem:[#allocation5 + $0x678] sm:$0xff] }
  0xf2   :  { %4021 = vmatprep.subr.bf16.mxu0 %v4020_v49  ;;  %1293 = vmatprep.mubr.f32.mxu1 %v71_v50  ;;  %v4036_v49 = vpack.c.bf16 %v479_v43, %v389_v42  ;;  %v75_v50 = vld [vmem:[#allocation2 + $0xb8] sm:$0xff]  ;;  %v212_v37 = vld [vmem:[#allocation5 + $0x230] sm:$0xff]  ;;  %v393_v42 = vld [vmem:[#allocation5 + $0x7d8] sm:$0xff] }
  0xf3   :  { %2833 = vmatprep.mubr.f32.mxu0 %v115_v51  ;;  %v119_v51 = vld [vmem:[#allocation2 + $0x218] sm:$0xff] }
  0xf4   :  { %v439_v41 = vld [vmem:[#allocation5 + $0x948] sm:$0xff] }
  0xf5   :  { %v483_v43 = vld [vmem:[#allocation5 + $0xaa8] sm:$0xff] }
  0xf8   :  { %3847 = vmatpush1.bf16.xpose.msra.mxu1 %v3846_v56  ;;  %v3862_v56 = vpack.c.bf16 %v434_v53, %v344_v52  ;;  %v348_v52 = vld [vmem:[#allocation5 + $0x670] sm:$0xff]  ;;  %v438_v53 = vld [vmem:[#allocation5 + $0x940] sm:$0xff] }
  0xf9   :  { %4023 = vmatpush1.bf16.xpose.msra.mxu0 %v4022_v57  ;;  %1237 = vmatprep.subr.mxu1 %v521_v58  ;;  %v4038_v57 = vpack.c.bf16 %v478_v55, %v388_v54  ;;  %v525_v58 = vld [vmem:[#allocation5 + $0xbf8] sm:$0xff]  ;;  %v392_v54 = vld [vmem:[#allocation5 + $0x7d0] sm:$0xff]  ;;  %v482_v55 = vld [vmem:[#allocation5 + $0xaa0] sm:$0xff] }
  0xfa   :  { %2777 = vmatprep.subr.mxu0 %v565_v59  ;;  %v569_v59 = vld [vmem:[#allocation5 + $0xd58] sm:$0xff] }
 0x100   :  { %1238 = vmatpush1.xpose.msra.mxu1 %v520_v0  ;;  %v524_v0 = vld [vmem:[#allocation5 + $0xbf0] sm:$0xff] }
 0x101   :  { %2778 = vmatpush1.xpose.msra.mxu0 %v564_v1  ;;  %3849 = vmatprep.subr.bf16.mxu1 %v3848_v2  ;;  %v568_v1 = vld [vmem:[#allocation5 + $0xd50] sm:$0xff]  ;;  %v3864_v2 = vpack.c.bf16 %v257_v61, %v167_v60  ;;  %v171_v60 = vld [vmem:[#allocation5 + $0xe8] sm:$0xff]  ;;  %v261_v61 = vld [vmem:[#allocation5 + $0x3b8] sm:$0xff] }
 0x102   :  { %4025 = vmatprep.subr.bf16.mxu0 %v4024_v6  ;;  %v4040_v6 = vpack.c.bf16 %v301_v63, %v211_v62  ;;  %v215_v62 = vld [vmem:[#allocation5 + $0x248] sm:$0xff]  ;;  %v305_v63 = vld [vmem:[#allocation5 + $0x518] sm:$0xff] }
 0x103   :  { %1294 = vmatmul.mubr.f32.vlgmr.msra.gmra.mrb[0].mxu1 %v70_v12  ;;  %v74_v12 = vld [vmem:[#allocation2 + $0xb0] sm:$0xff] }
 0x104   :  { %3851 = vmatpush1.bf16.xpose.msra.mxu1 %v3850_v13  ;;  %2834 = vmatmul.mubr.f32.vlgmr.msra.gmra.mrb[0].mxu0 %v114_v14  ;;  %v3866_v13 = vpack.c.bf16 %v256_v4, %v166_v3  ;;  %v118_v14 = vld [vmem:[#allocation2 + $0x210] sm:$0xff]  ;;  %v260_v4 = vld [vmem:[#allocation5 + $0x3b0] sm:$0xff] }
 0x105   :  { %4027 = vmatpush1.bf16.xpose.msra.mxu0 %v4026_v15  ;;  %3853 = vmatprep.subr.bf16.mxu1 %v3852_v16  ;;  %v4042_v15 = vpack.c.bf16 %v300_v7, %v210_v5  ;;  %v3868_v16 = vpack.c.bf16 %v437_v9, %v347_v8  ;;  %v170_v3 = vld [vmem:[#allocation5 + $0xe0] sm:$0xff]  ;;  %v304_v7 = vld [vmem:[#allocation5 + $0x510] sm:$0xff]  ;;  %v351_v8 = vld [vmem:[#allocation5 + $0x688] sm:$0xff] }
 0x106   :  { %4029 = vmatprep.subr.bf16.mxu0 %v4028_v17  ;;  %1363 = vmatprep.mubr.f32.mxu1 %v73_v18  ;;  %v4044_v17 = vpack.c.bf16 %v481_v11, %v391_v10  ;;  %v77_v18 = vld [vmem:[#allocation2 + $0xc8] sm:$0xff]  ;;  %v214_v5 = vld [vmem:[#allocation5 + $0x240] sm:$0xff]  ;;  %v395_v10 = vld [vmem:[#allocation5 + $0x7e8] sm:$0xff] }
 0x107   :  { %2903 = vmatprep.mubr.f32.mxu0 %v117_v19  ;;  %v121_v19 = vld [vmem:[#allocation2 + $0x228] sm:$0xff] }
 0x108   :  { %v441_v9 = vld [vmem:[#allocation5 + $0x958] sm:$0xff] }
 0x109   :  { %v485_v11 = vld [vmem:[#allocation5 + $0xab8] sm:$0xff] }
 0x10c   :  { %3855 = vmatpush1.bf16.xpose.msra.mxu1 %v3854_v24  ;;  %v3870_v24 = vpack.c.bf16 %v436_v21, %v346_v20  ;;  %v350_v20 = vld [vmem:[#allocation5 + $0x680] sm:$0xff]  ;;  %v440_v21 = vld [vmem:[#allocation5 + $0x950] sm:$0xff] }
 0x10d   :  { %4031 = vmatpush1.bf16.xpose.msra.mxu0 %v4030_v25  ;;  %1307 = vmatprep.subr.mxu1 %v523_v26  ;;  %v4046_v25 = vpack.c.bf16 %v480_v23, %v390_v22  ;;  %v527_v26 = vld [vmem:[#allocation5 + $0xc08] sm:$0xff]  ;;  %v394_v22 = vld [vmem:[#allocation5 + $0x7e0] sm:$0xff]  ;;  %v484_v23 = vld [vmem:[#allocation5 + $0xab0] sm:$0xff] }
 0x10e   :  { %2847 = vmatprep.subr.mxu0 %v567_v27  ;;  %v571_v27 = vld [vmem:[#allocation5 + $0xd68] sm:$0xff] }
 0x114   :  { %1308 = vmatpush1.xpose.msra.mxu1 %v522_v32  ;;  %v526_v32 = vld [vmem:[#allocation5 + $0xc00] sm:$0xff] }
 0x115   :  { %2848 = vmatpush1.xpose.msra.mxu0 %v566_v33  ;;  %3857 = vmatprep.subr.bf16.mxu1 %v3856_v34  ;;  %v570_v33 = vld [vmem:[#allocation5 + $0xd60] sm:$0xff]  ;;  %v3872_v34 = vpack.c.bf16 %v259_v29, %v169_v28  ;;  %v173_v28 = vld [vmem:[#allocation5 + $0xf8] sm:$0xff]  ;;  %v263_v29 = vld [vmem:[#allocation5 + $0x3c8] sm:$0xff] }
 0x116   :  { %4033 = vmatprep.subr.bf16.mxu0 %v4032_v38  ;;  %v4048_v38 = vpack.c.bf16 %v303_v31, %v213_v30  ;;  %v217_v30 = vld [vmem:[#allocation5 + $0x258] sm:$0xff]  ;;  %v307_v31 = vld [vmem:[#allocation5 + $0x528] sm:$0xff] }
 0x117   :  { %1364 = vmatmul.mubr.f32.vlgmr.msra.gmra.mrb[0].mxu1 %v72_v44  ;;  %v76_v44 = vld [vmem:[#allocation2 + $0xc0] sm:$0xff] }
 0x118   :  { %3859 = vmatpush1.bf16.xpose.msra.mxu1 %v3858_v45  ;;  %2904 = vmatmul.mubr.f32.vlgmr.msra.gmra.mrb[0].mxu0 %v116_v46  ;;  %v3874_v45 = vpack.c.bf16 %v258_v36, %v168_v35  ;;  %v120_v46 = vld [vmem:[#allocation2 + $0x220] sm:$0xff]  ;;  %v262_v36 = vld [vmem:[#allocation5 + $0x3c0] sm:$0xff] }
 0x119   :  { %4035 = vmatpush1.bf16.xpose.msra.mxu0 %v4034_v47  ;;  %3861 = vmatprep.subr.bf16.mxu1 %v3860_v48  ;;  %v4050_v47 = vpack.c.bf16 %v302_v39, %v212_v37  ;;  %v3876_v48 = vpack.c.bf16 %v439_v41, %v349_v40  ;;  %v172_v35 = vld [vmem:[#allocation5 + $0xf0] sm:$0xff]  ;;  %v306_v39 = vld [vmem:[#allocation5 + $0x520] sm:$0xff]  ;;  %v353_v40 = vld [vmem:[#allocation5 + $0x698] sm:$0xff] }
 0x11a   :  { %4037 = vmatprep.subr.bf16.mxu0 %v4036_v49  ;;  %1433 = vmatprep.mubr.f32.mxu1 %v75_v50  ;;  %v4052_v49 = vpack.c.bf16 %v483_v43, %v393_v42  ;;  %v79_v50 = vld [vmem:[#allocation2 + $0xd8] sm:$0xff]  ;;  %v216_v37 = vld [vmem:[#allocation5 + $0x250] sm:$0xff]  ;;  %v397_v42 = vld [vmem:[#allocation5 + $0x7f8] sm:$0xff] }
 0x11b   :  { %2973 = vmatprep.mubr.f32.mxu0 %v119_v51  ;;  %v123_v51 = vld [vmem:[#allocation2 + $0x238] sm:$0xff] }
 0x11c   :  { %v443_v41 = vld [vmem:[#allocation5 + $0x968] sm:$0xff] }
 0x11d   :  { %v487_v43 = vld [vmem:[#allocation5 + $0xac8] sm:$0xff] }
 0x120   :  { %3863 = vmatpush1.bf16.xpose.msra.mxu1 %v3862_v56  ;;  %v3878_v56 = vpack.c.bf16 %v438_v53, %v348_v52  ;;  %v352_v52 = vld [vmem:[#allocation5 + $0x690] sm:$0xff]  ;;  %v442_v53 = vld [vmem:[#allocation5 + $0x960] sm:$0xff] }
 0x121   :  { %4039 = vmatpush1.bf16.xpose.msra.mxu0 %v4038_v57  ;;  %1377 = vmatprep.subr.mxu1 %v525_v58  ;;  %v4054_v57 = vpack.c.bf16 %v482_v55, %v392_v54  ;;  %v529_v58 = vld [vmem:[#allocation5 + $0xc18] sm:$0xff]  ;;  %v396_v54 = vld [vmem:[#allocation5 + $0x7f0] sm:$0xff]  ;;  %v486_v55 = vld [vmem:[#allocation5 + $0xac0] sm:$0xff] }
 0x122   :  { %2917 = vmatprep.subr.mxu0 %v569_v59  ;;  %v573_v59 = vld [vmem:[#allocation5 + $0xd78] sm:$0xff] }
 0x128   :  { %1378 = vmatpush1.xpose.msra.mxu1 %v524_v0  ;;  %v528_v0 = vld [vmem:[#allocation5 + $0xc10] sm:$0xff] }
 0x129   :  { %2918 = vmatpush1.xpose.msra.mxu0 %v568_v1  ;;  %3865 = vmatprep.subr.bf16.mxu1 %v3864_v2  ;;  %v572_v1 = vld [vmem:[#allocation5 + $0xd70] sm:$0xff]  ;;  %v3880_v2 = vpack.c.bf16 %v261_v61, %v171_v60  ;;  %v175_v60 = vld [vmem:[#allocation5 + $0x108] sm:$0xff]  ;;  %v265_v61 = vld [vmem:[#allocation5 + $0x3d8] sm:$0xff] }
 0x12a   :  { %4041 = vmatprep.subr.bf16.mxu0 %v4040_v6  ;;  %v4056_v6 = vpack.c.bf16 %v305_v63, %v215_v62  ;;  %v219_v62 = vld [vmem:[#allocation5 + $0x268] sm:$0xff]  ;;  %v309_v63 = vld [vmem:[#allocation5 + $0x538] sm:$0xff] }
 0x12b   :  { %1434 = vmatmul.mubr.f32.vlgmr.msra.gmra.mrb[0].mxu1 %v74_v12  ;;  %v78_v12 = vld [vmem:[#allocation2 + $0xd0] sm:$0xff] }
 0x12c   :  { %3867 = vmatpush1.bf16.xpose.msra.mxu1 %v3866_v13  ;;  %2974 = vmatmul.mubr.f32.vlgmr.msra.gmra.mrb[0].mxu0 %v118_v14  ;;  %v3882_v13 = vpack.c.bf16 %v260_v4, %v170_v3  ;;  %v122_v14 = vld [vmem:[#allocation2 + $0x230] sm:$0xff]  ;;  %v264_v4 = vld [vmem:[#allocation5 + $0x3d0] sm:$0xff] }
 0x12d   :  { %4043 = vmatpush1.bf16.xpose.msra.mxu0 %v4042_v15  ;;  %3869 = vmatprep.subr.bf16.mxu1 %v3868_v16  ;;  %v4058_v15 = vpack.c.bf16 %v304_v7, %v214_v5  ;;  %v3884_v16 = vpack.c.bf16 %v441_v9, %v351_v8  ;;  %v174_v3 = vld [vmem:[#allocation5 + $0x100] sm:$0xff]  ;;  %v308_v7 = vld [vmem:[#allocation5 + $0x530] sm:$0xff]  ;;  %v355_v8 = vld [vmem:[#allocation5 + $0x6a8] sm:$0xff] }
 0x12e   :  { %4045 = vmatprep.subr.bf16.mxu0 %v4044_v17  ;;  %1503 = vmatprep.mubr.f32.mxu1 %v77_v18  ;;  %v4060_v17 = vpack.c.bf16 %v485_v11, %v395_v10  ;;  %v81_v18 = vld [vmem:[#allocation2 + $0xe8] sm:$0xff]  ;;  %v218_v5 = vld [vmem:[#allocation5 + $0x260] sm:$0xff]  ;;  %v399_v10 = vld [vmem:[#allocation5 + $0x808] sm:$0xff] }
 0x12f   :  { %3043 = vmatprep.mubr.f32.mxu0 %v121_v19  ;;  %v125_v19 = vld [vmem:[#allocation2 + $0x248] sm:$0xff] }
 0x130   :  { %v445_v9 = vld [vmem:[#allocation5 + $0x978] sm:$0xff] }
 0x131   :  { %v489_v11 = vld [vmem:[#allocation5 + $0xad8] sm:$0xff] }
 0x134   :  { %3871 = vmatpush1.bf16.xpose.msra.mxu1 %v3870_v24  ;;  %v3886_v24 = vpack.c.bf16 %v440_v21, %v350_v20  ;;  %v354_v20 = vld [vmem:[#allocation5 + $0x6a0] sm:$0xff]  ;;  %v444_v21 = vld [vmem:[#allocation5 + $0x970] sm:$0xff] }
 0x135   :  { %4047 = vmatpush1.bf16.xpose.msra.mxu0 %v4046_v25  ;;  %1447 = vmatprep.subr.mxu1 %v527_v26  ;;  %v4062_v25 = vpack.c.bf16 %v484_v23, %v394_v22  ;;  %v531_v26 = vld [vmem:[#allocation5 + $0xc28] sm:$0xff]  ;;  %v398_v22 = vld [vmem:[#allocation5 + $0x800] sm:$0xff]  ;;  %v488_v23 = vld [vmem:[#allocation5 + $0xad0] sm:$0xff] }
 0x136   :  { %2987 = vmatprep.subr.mxu0 %v571_v27  ;;  %v575_v27 = vld [vmem:[#allocation5 + $0xd88] sm:$0xff] }
 0x13c   :  { %1448 = vmatpush1.xpose.msra.mxu1 %v526_v32  ;;  %v530_v32 = vld [vmem:[#allocation5 + $0xc20] sm:$0xff] }
 0x13d   :  { %2988 = vmatpush1.xpose.msra.mxu0 %v570_v33  ;;  %3873 = vmatprep.subr.bf16.mxu1 %v3872_v34  ;;  %v574_v33 = vld [vmem:[#allocation5 + $0xd80] sm:$0xff]  ;;  %v3888_v34 = vpack.c.bf16 %v263_v29, %v173_v28  ;;  %v177_v28 = vld [vmem:[#allocation5 + $0x118] sm:$0xff]  ;;  %v267_v29 = vld [vmem:[#allocation5 + $0x3e8] sm:$0xff] }
 0x13e   :  { %4049 = vmatprep.subr.bf16.mxu0 %v4048_v38  ;;  %v4064_v38 = vpack.c.bf16 %v307_v31, %v217_v30  ;;  %v221_v30 = vld [vmem:[#allocation5 + $0x278] sm:$0xff]  ;;  %v311_v31 = vld [vmem:[#allocation5 + $0x548] sm:$0xff] }
 0x13f   :  { %1504 = vmatmul.mubr.f32.vlgmr.msra.gmra.mrb[0].mxu1 %v76_v44  ;;  %v80_v44 = vld [vmem:[#allocation2 + $0xe0] sm:$0xff] }
 0x140   :  { %3875 = vmatpush1.bf16.xpose.msra.mxu1 %v3874_v45  ;;  %3044 = vmatmul.mubr.f32.vlgmr.msra.gmra.mrb[0].mxu0 %v120_v46  ;;  %v3890_v45 = vpack.c.bf16 %v262_v36, %v172_v35  ;;  %v124_v46 = vld [vmem:[#allocation2 + $0x240] sm:$0xff]  ;;  %v266_v36 = vld [vmem:[#allocation5 + $0x3e0] sm:$0xff] }
 0x141   :  { %4051 = vmatpush1.bf16.xpose.msra.mxu0 %v4050_v47  ;;  %3877 = vmatprep.subr.bf16.mxu1 %v3876_v48  ;;  %v4066_v47 = vpack.c.bf16 %v306_v39, %v216_v37  ;;  %v3892_v48 = vpack.c.bf16 %v443_v41, %v353_v40  ;;  %v176_v35 = vld [vmem:[#allocation5 + $0x110] sm:$0xff]  ;;  %v310_v39 = vld [vmem:[#allocation5 + $0x540] sm:$0xff]  ;;  %v357_v40 = vld [vmem:[#allocation5 + $0x6b8] sm:$0xff] }
 0x142   :  { %4053 = vmatprep.subr.bf16.mxu0 %v4052_v49  ;;  %1573 = vmatprep.mubr.f32.mxu1 %v79_v50  ;;  %v4068_v49 = vpack.c.bf16 %v487_v43, %v397_v42  ;;  %v83_v50 = vld [vmem:[#allocation2 + $0xf8] sm:$0xff]  ;;  %v220_v37 = vld [vmem:[#allocation5 + $0x270] sm:$0xff]  ;;  %v401_v42 = vld [vmem:[#allocation5 + $0x818] sm:$0xff] }
 0x143   :  { %3113 = vmatprep.mubr.f32.mxu0 %v123_v51  ;;  %v127_v51 = vld [vmem:[#allocation2 + $0x258] sm:$0xff] }
 0x144   :  { %v447_v41 = vld [vmem:[#allocation5 + $0x988] sm:$0xff] }
 0x145   :  { %v491_v43 = vld [vmem:[#allocation5 + $0xae8] sm:$0xff] }
 0x148   :  { %3879 = vmatpush1.bf16.xpose.msra.mxu1 %v3878_v56  ;;  %v3894_v56 = vpack.c.bf16 %v442_v53, %v352_v52  ;;  %v356_v52 = vld [vmem:[#allocation5 + $0x6b0] sm:$0xff]  ;;  %v446_v53 = vld [vmem:[#allocation5 + $0x980] sm:$0xff] }
 0x149   :  { %4055 = vmatpush1.bf16.xpose.msra.mxu0 %v4054_v57  ;;  %1517 = vmatprep.subr.mxu1 %v529_v58  ;;  %v4070_v57 = vpack.c.bf16 %v486_v55, %v396_v54  ;;  %v533_v58 = vld [vmem:[#allocation5 + $0xc38] sm:$0xff]  ;;  %v400_v54 = vld [vmem:[#allocation5 + $0x810] sm:$0xff]  ;;  %v490_v55 = vld [vmem:[#allocation5 + $0xae0] sm:$0xff] }
 0x14a   :  { %3057 = vmatprep.subr.mxu0 %v573_v59  ;;  %v577_v59 = vld [vmem:[#allocation5 + $0xd98] sm:$0xff] }
 0x150   :  { %1518 = vmatpush1.xpose.msra.mxu1 %v528_v0  ;;  %v532_v0 = vld [vmem:[#allocation5 + $0xc30] sm:$0xff] }
 0x151   :  { %3058 = vmatpush1.xpose.msra.mxu0 %v572_v1  ;;  %3881 = vmatprep.subr.bf16.mxu1 %v3880_v2  ;;  %v576_v1 = vld [vmem:[#allocation5 + $0xd90] sm:$0xff]  ;;  %v3896_v2 = vpack.c.bf16 %v265_v61, %v175_v60  ;;  %v179_v60 = vld [vmem:[#allocation5 + $0x128] sm:$0xff]  ;;  %v269_v61 = vld [vmem:[#allocation5 + $0x3f8] sm:$0xff] }
 0x152   :  { %4057 = vmatprep.subr.bf16.mxu0 %v4056_v6  ;;  %v4072_v6 = vpack.c.bf16 %v309_v63, %v219_v62  ;;  %v223_v62 = vld [vmem:[#allocation5 + $0x288] sm:$0xff]  ;;  %v313_v63 = vld [vmem:[#allocation5 + $0x558] sm:$0xff] }
 0x153   :  { %1574 = vmatmul.mubr.f32.vlgmr.msra.gmra.mrb[0].mxu1 %v78_v12  ;;  %v82_v12 = vld [vmem:[#allocation2 + $0xf0] sm:$0xff] }
 0x154   :  { %3883 = vmatpush1.bf16.xpose.msra.mxu1 %v3882_v13  ;;  %3114 = vmatmul.mubr.f32.vlgmr.msra.gmra.mrb[0].mxu0 %v122_v14  ;;  %v3898_v13 = vpack.c.bf16 %v264_v4, %v174_v3  ;;  %v126_v14 = vld [vmem:[#allocation2 + $0x250] sm:$0xff]  ;;  %v268_v4 = vld [vmem:[#allocation5 + $0x3f0] sm:$0xff] }
 0x155   :  { %4059 = vmatpush1.bf16.xpose.msra.mxu0 %v4058_v15  ;;  %3885 = vmatprep.subr.bf16.mxu1 %v3884_v16  ;;  %v4074_v15 = vpack.c.bf16 %v308_v7, %v218_v5  ;;  %v3900_v16 = vpack.c.bf16 %v445_v9, %v355_v8  ;;  %v178_v3 = vld [vmem:[#allocation5 + $0x120] sm:$0xff]  ;;  %v312_v7 = vld [vmem:[#allocation5 + $0x550] sm:$0xff]  ;;  %v359_v8 = vld [vmem:[#allocation5 + $0x6c8] sm:$0xff] }
 0x156   :  { %4061 = vmatprep.subr.bf16.mxu0 %v4060_v17  ;;  %1643 = vmatprep.mubr.f32.mxu1 %v81_v18  ;;  %v4076_v17 = vpack.c.bf16 %v489_v11, %v399_v10  ;;  %v85_v18 = vld [vmem:[#allocation2 + $0x108] sm:$0xff]  ;;  %v222_v5 = vld [vmem:[#allocation5 + $0x280] sm:$0xff]  ;;  %v403_v10 = vld [vmem:[#allocation5 + $0x828] sm:$0xff] }
 0x157   :  { %3183 = vmatprep.mubr.f32.mxu0 %v125_v19  ;;  %v129_v19 = vld [vmem:[#allocation2 + $0x268] sm:$0xff] }
 0x158   :  { %v449_v9 = vld [vmem:[#allocation5 + $0x998] sm:$0xff] }
 0x159   :  { %v493_v11 = vld [vmem:[#allocation5 + $0xaf8] sm:$0xff] }
 0x15c   :  { %3887 = vmatpush1.bf16.xpose.msra.mxu1 %v3886_v24  ;;  %v3902_v24 = vpack.c.bf16 %v444_v21, %v354_v20  ;;  %v358_v20 = vld [vmem:[#allocation5 + $0x6c0] sm:$0xff]  ;;  %v448_v21 = vld [vmem:[#allocation5 + $0x990] sm:$0xff] }
 0x15d   :  { %4063 = vmatpush1.bf16.xpose.msra.mxu0 %v4062_v25  ;;  %1587 = vmatprep.subr.mxu1 %v531_v26  ;;  %v4078_v25 = vpack.c.bf16 %v488_v23, %v398_v22  ;;  %v535_v26 = vld [vmem:[#allocation5 + $0xc48] sm:$0xff]  ;;  %v402_v22 = vld [vmem:[#allocation5 + $0x820] sm:$0xff]  ;;  %v492_v23 = vld [vmem:[#allocation5 + $0xaf0] sm:$0xff] }
 0x15e   :  { %3127 = vmatprep.subr.mxu0 %v575_v27  ;;  %v579_v27 = vld [vmem:[#allocation5 + $0xda8] sm:$0xff] }
 0x164   :  { %1588 = vmatpush1.xpose.msra.mxu1 %v530_v32  ;;  %v534_v32 = vld [vmem:[#allocation5 + $0xc40] sm:$0xff] }
 0x165   :  { %3128 = vmatpush1.xpose.msra.mxu0 %v574_v33  ;;  %3889 = vmatprep.subr.bf16.mxu1 %v3888_v34  ;;  %v578_v33 = vld [vmem:[#allocation5 + $0xda0] sm:$0xff]  ;;  %v3904_v34 = vpack.c.bf16 %v267_v29, %v177_v28  ;;  %v181_v28 = vld [vmem:[#allocation5 + $0x138] sm:$0xff]  ;;  %v271_v29 = vld [vmem:[#allocation5 + $0x408] sm:$0xff] }
 0x166   :  { %4065 = vmatprep.subr.bf16.mxu0 %v4064_v38  ;;  %v4080_v38 = vpack.c.bf16 %v311_v31, %v221_v30  ;;  %v225_v30 = vld [vmem:[#allocation5 + $0x298] sm:$0xff]  ;;  %v315_v31 = vld [vmem:[#allocation5 + $0x568] sm:$0xff] }
 0x167   :  { %1644 = vmatmul.mubr.f32.vlgmr.msra.gmra.mrb[0].mxu1 %v80_v44  ;;  %v84_v44 = vld [vmem:[#allocation2 + $0x100] sm:$0xff] }
 0x168   :  { %3891 = vmatpush1.bf16.xpose.msra.mxu1 %v3890_v45  ;;  %3184 = vmatmul.mubr.f32.vlgmr.msra.gmra.mrb[0].mxu0 %v124_v46  ;;  %v3906_v45 = vpack.c.bf16 %v266_v36, %v176_v35  ;;  %v128_v46 = vld [vmem:[#allocation2 + $0x260] sm:$0xff]  ;;  %v270_v36 = vld [vmem:[#allocation5 + $0x400] sm:$0xff] }
 0x169   :  { %4067 = vmatpush1.bf16.xpose.msra.mxu0 %v4066_v47  ;;  %3893 = vmatprep.subr.bf16.mxu1 %v3892_v48  ;;  %v4082_v47 = vpack.c.bf16 %v310_v39, %v220_v37  ;;  %v3908_v48 = vpack.c.bf16 %v447_v41, %v357_v40  ;;  %v180_v35 = vld [vmem:[#allocation5 + $0x130] sm:$0xff]  ;;  %v314_v39 = vld [vmem:[#allocation5 + $0x560] sm:$0xff]  ;;  %v361_v40 = vld [vmem:[#allocation5 + $0x6d8] sm:$0xff] }
 0x16a   :  { %4069 = vmatprep.subr.bf16.mxu0 %v4068_v49  ;;  %1713 = vmatprep.mubr.f32.mxu1 %v83_v50  ;;  %v4084_v49 = vpack.c.bf16 %v491_v43, %v401_v42  ;;  %v87_v50 = vld [vmem:[#allocation2 + $0x118] sm:$0xff]  ;;  %v224_v37 = vld [vmem:[#allocation5 + $0x290] sm:$0xff]  ;;  %v405_v42 = vld [vmem:[#allocation5 + $0x838] sm:$0xff] }
 0x16b   :  { %3253 = vmatprep.mubr.f32.mxu0 %v127_v51  ;;  %v131_v51 = vld [vmem:[#allocation2 + $0x278] sm:$0xff] }
 0x16c   :  { %v451_v41 = vld [vmem:[#allocation5 + $0x9a8] sm:$0xff] }
 0x16d   :  { %v495_v43 = vld [vmem:[#allocation5 + $0xb08] sm:$0xff] }
 0x170   :  { %3895 = vmatpush1.bf16.xpose.msra.mxu1 %v3894_v56  ;;  %v3910_v56 = vpack.c.bf16 %v446_v53, %v356_v52  ;;  %v360_v52 = vld [vmem:[#allocation5 + $0x6d0] sm:$0xff]  ;;  %v450_v53 = vld [vmem:[#allocation5 + $0x9a0] sm:$0xff] }
 0x171   :  { %4071 = vmatpush1.bf16.xpose.msra.mxu0 %v4070_v57  ;;  %1657 = vmatprep.subr.mxu1 %v533_v58  ;;  %v4086_v57 = vpack.c.bf16 %v490_v55, %v400_v54  ;;  %v537_v58 = vld [vmem:[#allocation5 + $0xc58] sm:$0xff]  ;;  %v404_v54 = vld [vmem:[#allocation5 + $0x830] sm:$0xff]  ;;  %v494_v55 = vld [vmem:[#allocation5 + $0xb00] sm:$0xff] }
 0x172   :  { %3197 = vmatprep.subr.mxu0 %v577_v59  ;;  %v581_v59 = vld [vmem:[#allocation5 + $0xdb8] sm:$0xff] }
 0x178   :  { %1658 = vmatpush1.xpose.msra.mxu1 %v532_v0  ;;  %v536_v0 = vld [vmem:[#allocation5 + $0xc50] sm:$0xff] }
 0x179   :  { %3198 = vmatpush1.xpose.msra.mxu0 %v576_v1  ;;  %3897 = vmatprep.subr.bf16.mxu1 %v3896_v2  ;;  %v580_v1 = vld [vmem:[#allocation5 + $0xdb0] sm:$0xff]  ;;  %v3912_v2 = vpack.c.bf16 %v269_v61, %v179_v60  ;;  %v183_v60 = vld [vmem:[#allocation5 + $0x148] sm:$0xff]  ;;  %v273_v61 = vld [vmem:[#allocation5 + $0x418] sm:$0xff] }
 0x17a   :  { %4073 = vmatprep.subr.bf16.mxu0 %v4072_v6  ;;  %v4088_v6 = vpack.c.bf16 %v313_v63, %v223_v62  ;;  %v227_v62 = vld [vmem:[#allocation5 + $0x2a8] sm:$0xff]  ;;  %v317_v63 = vld [vmem:[#allocation5 + $0x578] sm:$0xff] }
 0x17b   :  { %1714 = vmatmul.mubr.f32.vlgmr.msra.gmra.mrb[0].mxu1 %v82_v12  ;;  %v86_v12 = vld [vmem:[#allocation2 + $0x110] sm:$0xff] }
 0x17c   :  { %3899 = vmatpush1.bf16.xpose.msra.mxu1 %v3898_v13  ;;  %3254 = vmatmul.mubr.f32.vlgmr.msra.gmra.mrb[0].mxu0 %v126_v14  ;;  %v3914_v13 = vpack.c.bf16 %v268_v4, %v178_v3  ;;  %v130_v14 = vld [vmem:[#allocation2 + $0x270] sm:$0xff]  ;;  %v272_v4 = vld [vmem:[#allocation5 + $0x410] sm:$0xff] }
 0x17d   :  { %4075 = vmatpush1.bf16.xpose.msra.mxu0 %v4074_v15  ;;  %3901 = vmatprep.subr.bf16.mxu1 %v3900_v16  ;;  %v4090_v15 = vpack.c.bf16 %v312_v7, %v222_v5  ;;  %v3916_v16 = vpack.c.bf16 %v449_v9, %v359_v8  ;;  %v182_v3 = vld [vmem:[#allocation5 + $0x140] sm:$0xff]  ;;  %v316_v7 = vld [vmem:[#allocation5 + $0x570] sm:$0xff]  ;;  %v363_v8 = vld [vmem:[#allocation5 + $0x6e8] sm:$0xff] }
 0x17e   :  { %4077 = vmatprep.subr.bf16.mxu0 %v4076_v17  ;;  %1783 = vmatprep.mubr.f32.mxu1 %v85_v18  ;;  %v4092_v17 = vpack.c.bf16 %v493_v11, %v403_v10  ;;  %v89_v18 = vld [vmem:[#allocation2 + $0x128] sm:$0xff]  ;;  %v226_v5 = vld [vmem:[#allocation5 + $0x2a0] sm:$0xff]  ;;  %v407_v10 = vld [vmem:[#allocation5 + $0x848] sm:$0xff] }
 0x17f   :  { %3323 = vmatprep.mubr.f32.mxu0 %v129_v19  ;;  %v133_v19 = vld [vmem:[#allocation2 + $0x288] sm:$0xff] }
 0x180   :  { %v453_v9 = vld [vmem:[#allocation5 + $0x9b8] sm:$0xff] }
 0x181   :  { %v497_v11 = vld [vmem:[#allocation5 + $0xb18] sm:$0xff] }
 0x184   :  { %3903 = vmatpush1.bf16.xpose.msra.mxu1 %v3902_v24  ;;  %v3918_v24 = vpack.c.bf16 %v448_v21, %v358_v20  ;;  %v362_v20 = vld [vmem:[#allocation5 + $0x6e0] sm:$0xff]  ;;  %v452_v21 = vld [vmem:[#allocation5 + $0x9b0] sm:$0xff] }
 0x185   :  { %4079 = vmatpush1.bf16.xpose.msra.mxu0 %v4078_v25  ;;  %1727 = vmatprep.subr.mxu1 %v535_v26  ;;  %v4094_v25 = vpack.c.bf16 %v492_v23, %v402_v22  ;;  %v539_v26 = vld [vmem:[#allocation5 + $0xc68] sm:$0xff]  ;;  %v406_v22 = vld [vmem:[#allocation5 + $0x840] sm:$0xff]  ;;  %v496_v23 = vld [vmem:[#allocation5 + $0xb10] sm:$0xff] }
 0x186   :  { %3267 = vmatprep.subr.mxu0 %v579_v27  ;;  %v583_v27 = vld [vmem:[#allocation5 + $0xdc8] sm:$0xff] }
 0x18c   :  { %1728 = vmatpush1.xpose.msra.mxu1 %v534_v32  ;;  %v538_v32 = vld [vmem:[#allocation5 + $0xc60] sm:$0xff] }
 0x18d   :  { %3268 = vmatpush1.xpose.msra.mxu0 %v578_v33  ;;  %3905 = vmatprep.subr.bf16.mxu1 %v3904_v34  ;;  %v582_v33 = vld [vmem:[#allocation5 + $0xdc0] sm:$0xff]  ;;  %v3920_v34 = vpack.c.bf16 %v271_v29, %v181_v28  ;;  %v185_v28 = vld [vmem:[#allocation5 + $0x158] sm:$0xff]  ;;  %v275_v29 = vld [vmem:[#allocation5 + $0x428] sm:$0xff] }
 0x18e   :  { %4081 = vmatprep.subr.bf16.mxu0 %v4080_v38  ;;  %v4096_v38 = vpack.c.bf16 %v315_v31, %v225_v30  ;;  %v229_v30 = vld [vmem:[#allocation5 + $0x2b8] sm:$0xff]  ;;  %v319_v31 = vld [vmem:[#allocation5 + $0x588] sm:$0xff] }
 0x18f   :  { %1784 = vmatmul.mubr.f32.vlgmr.msra.gmra.mrb[0].mxu1 %v84_v44  ;;  %v88_v44 = vld [vmem:[#allocation2 + $0x120] sm:$0xff] }
 0x190   :  { %3907 = vmatpush1.bf16.xpose.msra.mxu1 %v3906_v45  ;;  %3324 = vmatmul.mubr.f32.vlgmr.msra.gmra.mrb[0].mxu0 %v128_v46  ;;  %v3922_v45 = vpack.c.bf16 %v270_v36, %v180_v35  ;;  %v132_v46 = vld [vmem:[#allocation2 + $0x280] sm:$0xff]  ;;  %v274_v36 = vld [vmem:[#allocation5 + $0x420] sm:$0xff] }
 0x191   :  { %4083 = vmatpush1.bf16.xpose.msra.mxu0 %v4082_v47  ;;  %3909 = vmatprep.subr.bf16.mxu1 %v3908_v48  ;;  %v4098_v47 = vpack.c.bf16 %v314_v39, %v224_v37  ;;  %v3924_v48 = vpack.c.bf16 %v451_v41, %v361_v40  ;;  %v184_v35 = vld [vmem:[#allocation5 + $0x150] sm:$0xff]  ;;  %v318_v39 = vld [vmem:[#allocation5 + $0x580] sm:$0xff]  ;;  %v365_v40 = vld [vmem:[#allocation5 + $0x6f8] sm:$0xff] }
 0x192   :  { %4085 = vmatprep.subr.bf16.mxu0 %v4084_v49  ;;  %1853 = vmatprep.mubr.f32.mxu1 %v87_v50  ;;  %v4100_v49 = vpack.c.bf16 %v495_v43, %v405_v42  ;;  %v91_v50 = vld [vmem:[#allocation2 + $0x138] sm:$0xff]  ;;  %v228_v37 = vld [vmem:[#allocation5 + $0x2b0] sm:$0xff]  ;;  %v409_v42 = vld [vmem:[#allocation5 + $0x858] sm:$0xff] }
 0x193   :  { %3393 = vmatprep.mubr.f32.mxu0 %v131_v51  ;;  %v135_v51 = vld [vmem:[#allocation2 + $0x298] sm:$0xff] }
 0x194   :  { %v455_v41 = vld [vmem:[#allocation5 + $0x9c8] sm:$0xff] }
 0x195   :  { %v499_v43 = vld [vmem:[#allocation5 + $0xb28] sm:$0xff] }
 0x198   :  { %3911 = vmatpush1.bf16.xpose.msra.mxu1 %v3910_v56  ;;  %v3926_v56 = vpack.c.bf16 %v450_v53, %v360_v52  ;;  %v364_v52 = vld [vmem:[#allocation5 + $0x6f0] sm:$0xff]  ;;  %v454_v53 = vld [vmem:[#allocation5 + $0x9c0] sm:$0xff] }
 0x199   :  { %4087 = vmatpush1.bf16.xpose.msra.mxu0 %v4086_v57  ;;  %1797 = vmatprep.subr.mxu1 %v537_v58  ;;  %v4102_v57 = vpack.c.bf16 %v494_v55, %v404_v54  ;;  %v541_v58 = vld [vmem:[#allocation5 + $0xc78] sm:$0xff]  ;;  %v408_v54 = vld [vmem:[#allocation5 + $0x850] sm:$0xff]  ;;  %v498_v55 = vld [vmem:[#allocation5 + $0xb20] sm:$0xff] }
 0x19a   :  { %3337 = vmatprep.subr.mxu0 %v581_v59  ;;  %v585_v59 = vld [vmem:[#allocation5 + $0xdd8] sm:$0xff] }
 0x1a0   :  { %1798 = vmatpush1.xpose.msra.mxu1 %v536_v0  ;;  %v540_v0 = vld [vmem:[#allocation5 + $0xc70] sm:$0xff] }
 0x1a1   :  { %3338 = vmatpush1.xpose.msra.mxu0 %v580_v1  ;;  %3913 = vmatprep.subr.bf16.mxu1 %v3912_v2  ;;  %v584_v1 = vld [vmem:[#allocation5 + $0xdd0] sm:$0xff]  ;;  %v3928_v2 = vpack.c.bf16 %v273_v61, %v183_v60  ;;  %v231_v60 = vld [vmem:[#allocation5 + $0x2c8] sm:$0xff]  ;;  %v321_v61 = vld [vmem:[#allocation5 + $0x598] sm:$0xff] }
 0x1a2   :  { %4089 = vmatprep.subr.bf16.mxu0 %v4088_v6  ;;  %v4104_v6 = vpack.c.bf16 %v317_v63, %v227_v62  ;;  %v544_v62 = vld [vmem:[#allocation5 + $0xc90] sm:$0xff] }
 0x1a3   :  { %1854 = vmatmul.mubr.f32.vlgmr.msra.gmra.mrb[0].mxu1 %v86_v12  ;;  %v90_v12 = vld [vmem:[#allocation2 + $0x130] sm:$0xff]  ;;  %v588_v63 = vld [vmem:[#allocation5 + $0xdf0] sm:$0xff] }
 0x1a4   :  { %3915 = vmatpush1.bf16.xpose.msra.mxu1 %v3914_v13  ;;  %3394 = vmatmul.mubr.f32.vlgmr.msra.gmra.mrb[0].mxu0 %v130_v14  ;;  %v3930_v13 = vpack.c.bf16 %v272_v4, %v182_v3  ;;  %v134_v14 = vld [vmem:[#allocation2 + $0x290] sm:$0xff]  ;;  %v411_v3 = vld [vmem:[#allocation5 + $0x868] sm:$0xff]  ;;  %v501_v4 = vld [vmem:[#allocation5 + $0xb38] sm:$0xff] }
 0x1a5   :  { %4091 = vmatpush1.bf16.xpose.msra.mxu0 %v4090_v15  ;;  %3917 = vmatprep.subr.bf16.mxu1 %v3916_v16  ;;  %v4106_v15 = vpack.c.bf16 %v316_v7, %v226_v5  ;;  %v3932_v16 = vpack.c.bf16 %v453_v9, %v363_v8  ;;  %v94_v5 = vld [vmem:[#allocation2 + $0x150] sm:$0xff]  ;;  %v4124_v8 = vpack.c.bf16 %v501_v4, %v411_v3  ;;  %v141_v9 = vld [vmem:[#allocation2 + $0x2c8] sm:$0xff] }
 0x1a6   :  { %4093 = vmatprep.subr.bf16.mxu0 %v4092_v17  ;;  %1923 = vmatprep.mubr.f32.mxu1 %v89_v18  ;;  %v4108_v17 = vpack.c.bf16 %v497_v11, %v407_v10  ;;  %v93_v18 = vld [vmem:[#allocation2 + $0x148] sm:$0xff]  ;;  %v410_v10 = vld [vmem:[#allocation5 + $0x860] sm:$0xff]  ;;  %v500_v11 = vld [vmem:[#allocation5 + $0xb30] sm:$0xff] }
 0x1a7   :  { %3463 = vmatprep.mubr.f32.mxu0 %v133_v19  ;;  %v137_v19 = vld [vmem:[#allocation2 + $0x2a8] sm:$0xff] }
 0x1ac   :  { %3919 = vmatpush1.bf16.xpose.msra.mxu1 %v3918_v24  ;;  %v3934_v24 = vpack.c.bf16 %v452_v21, %v362_v20 }
 0x1ad   :  { %4095 = vmatpush1.bf16.xpose.msra.mxu0 %v4094_v25  ;;  %1867 = vmatprep.subr.mxu1 %v539_v26  ;;  %v4110_v25 = vpack.c.bf16 %v496_v23, %v406_v22  ;;  %v543_v26 = vld [vmem:[#allocation5 + $0xc88] sm:$0xff] }
 0x1ae   :  { %3407 = vmatprep.subr.mxu0 %v583_v27  ;;  %v587_v27 = vld [vmem:[#allocation5 + $0xde8] sm:$0xff] }
 0x1b4   :  { %1868 = vmatpush1.xpose.msra.mxu1 %v538_v32  ;;  %v542_v32 = vld [vmem:[#allocation5 + $0xc80] sm:$0xff] }
 0x1b5   :  { %3408 = vmatpush1.xpose.msra.mxu0 %v582_v33  ;;  %3921 = vmatprep.subr.bf16.mxu1 %v3920_v34  ;;  %v586_v33 = vld [vmem:[#allocation5 + $0xde0] sm:$0xff]  ;;  %v3936_v34 = vpack.c.bf16 %v275_v29, %v185_v28 }
 0x1b6   :  { %4097 = vmatprep.subr.bf16.mxu0 %v4096_v38  ;;  %v4112_v38 = vpack.c.bf16 %v319_v31, %v229_v30 }
 0x1b7   :  { %1924 = vmatmul.mubr.f32.vlgmr.msra.gmra.mrb[0].mxu1 %v88_v44  ;;  %v92_v44 = vld [vmem:[#allocation2 + $0x140] sm:$0xff] }
 0x1b8   :  { %3923 = vmatpush1.bf16.xpose.msra.mxu1 %v3922_v45  ;;  %3464 = vmatmul.mubr.f32.vlgmr.msra.gmra.mrb[0].mxu0 %v132_v46  ;;  %v3938_v45 = vpack.c.bf16 %v274_v36, %v184_v35  ;;  %v136_v46 = vld [vmem:[#allocation2 + $0x2a0] sm:$0xff] }
 0x1b9   :  { %4099 = vmatpush1.bf16.xpose.msra.mxu0 %v4098_v47  ;;  %3925 = vmatprep.subr.bf16.mxu1 %v3924_v48  ;;  %v4114_v47 = vpack.c.bf16 %v318_v39, %v228_v37  ;;  %v3940_v48 = vpack.c.bf16 %v455_v41, %v365_v40 }
 0x1ba   :  { %4101 = vmatprep.subr.bf16.mxu0 %v4100_v49  ;;  %1993 = vmatprep.mubr.f32.mxu1 %v91_v50  ;;  %v4116_v49 = vpack.c.bf16 %v499_v43, %v409_v42  ;;  %v95_v50 = vld [vmem:[#allocation2 + $0x158] sm:$0xff] }
 0x1bb   :  { %3533 = vmatprep.mubr.f32.mxu0 %v135_v51  ;;  %v139_v51 = vld [vmem:[#allocation2 + $0x2b8] sm:$0xff] }
 0x1c0   :  { %3927 = vmatpush1.bf16.xpose.msra.mxu1 %v3926_v56  ;;  %v3942_v56 = vpack.c.bf16 %v454_v53, %v364_v52 }
 0x1c1   :  { %4103 = vmatpush1.bf16.xpose.msra.mxu0 %v4102_v57  ;;  %1937 = vmatprep.subr.mxu1 %v541_v58  ;;  %v4118_v57 = vpack.c.bf16 %v498_v55, %v408_v54  ;;  %v545_v58 = vld [vmem:[#allocation5 + $0xc98] sm:$0xff] }
 0x1c2   :  { %3477 = vmatprep.subr.mxu0 %v585_v59  ;;  %v589_v59 = vld [vmem:[#allocation5 + $0xdf8] sm:$0xff] }
 0x1c8   :  { %1938 = vmatpush1.xpose.msra.mxu1 %v540_v0  ;;  %v4120_v0 = vpack.c.bf16 %v321_v61, %v231_v60 }
 0x1c9   :  { %3478 = vmatpush1.xpose.msra.mxu0 %v584_v1  ;;  %3929 = vmatprep.subr.bf16.mxu1 %v3928_v2  ;;  %v230_v1 = vld [vmem:[#allocation5 + $0x2c0] sm:$0xff]  ;;  %v320_v2 = vld [vmem:[#allocation5 + $0x590] sm:$0xff] }
 0x1ca   :  { %4105 = vmatprep.subr.bf16.mxu0 %v4104_v6  ;;  %v138_v6 = vld [vmem:[#allocation2 + $0x2b0] sm:$0xff]  ;;  %v4122_v7 = vpack.c.bf16 %v320_v2, %v230_v1 }
 0x1cb   :  { %1994 = vmatmul.mubr.f32.vlgmr.msra.gmra.mrb[0].mxu1 %v90_v12  ;;  %v4126_v12 = vpack.c.bf16 %v500_v11, %v410_v10 }
 0x1cc   :  { %3931 = vmatpush1.bf16.xpose.msra.mxu1 %v3930_v13  ;;  %3534 = vmatmul.mubr.f32.vlgmr.msra.gmra.mrb[0].mxu0 %v134_v14  ;;  %v591_v13 = vld [vmem:[#allocation5 + $0xe08] sm:$0xff]  ;;  %v590_v14 = vld [vmem:[#allocation5 + $0xe00] sm:$0xff] }
 0x1cd   :  { %4107 = vmatpush1.bf16.xpose.msra.mxu0 %v4106_v15  ;;  %3933 = vmatprep.subr.bf16.mxu1 %v3932_v16  ;;  %v140_v15 = vld [vmem:[#allocation2 + $0x2c0] sm:$0xff] }
 0x1ce   :  { %4109 = vmatprep.subr.bf16.mxu0 %v4108_v17  ;;  %2063 = vmatprep.mubr.f32.mxu1 %v93_v18  ;;  %v3767_v18 = vld [vmem:[#allocation7] ss:$0 sm:$0xff] }
 0x1cf   :  { %3603 = vmatprep.mubr.f32.mxu0 %v137_v19 }
 0x1d4   :  { %3935 = vmatpush1.bf16.xpose.msra.mxu1 %v3934_v24 }
 0x1d5   :  { %4111 = vmatpush1.bf16.xpose.msra.mxu0 %v4110_v25  ;;  %2007 = vmatprep.subr.mxu1 %v543_v26 }
 0x1d6   :  { %3547 = vmatprep.subr.mxu0 %v587_v27 }
 0x1dc   :  { %2008 = vmatpush1.xpose.msra.mxu1 %v542_v32 }
 0x1dd   :  { %3548 = vmatpush1.xpose.msra.mxu0 %v586_v33  ;;  %3937 = vmatprep.subr.bf16.mxu1 %v3936_v34 }
 0x1de   :  { %4113 = vmatprep.subr.bf16.mxu0 %v4112_v38 }
 0x1df   :  { %2064 = vmatmul.mubr.f32.vlgmr.msra.gmra.mrb[0].mxu1 %v92_v44 }
 0x1e0   :  { %3939 = vmatpush1.bf16.xpose.msra.mxu1 %v3938_v45  ;;  %3604 = vmatmul.mubr.f32.vlgmr.msra.gmra.mrb[0].mxu0 %v136_v46 }
 0x1e1   :  { %4115 = vmatpush1.bf16.xpose.msra.mxu0 %v4114_v47  ;;  %3941 = vmatprep.subr.bf16.mxu1 %v3940_v48 }
 0x1e2   :  { %4117 = vmatprep.subr.bf16.mxu0 %v4116_v49  ;;  %2133 = vmatprep.mubr.f32.mxu1 %v95_v50 }
 0x1e3   :  { %3673 = vmatprep.mubr.f32.mxu0 %v139_v51 }
 0x1e8   :  { %3943 = vmatpush1.bf16.xpose.msra.mxu1 %v3942_v56 }
 0x1e9   :  { %4119 = vmatpush1.bf16.xpose.msra.mxu0 %v4118_v57  ;;  %2077 = vmatprep.subr.mxu1 %v545_v58 }
 0x1ea   :  { %3617 = vmatprep.subr.mxu0 %v589_v59 }
 0x1f0   :  { %2078 = vmatpush1.xpose.msra.mxu1 %v544_v62 }
 0x1f1   :  { %3618 = vmatpush1.xpose.msra.mxu0 %v588_v63 }
 0x1f2   :  { %4121 = vmatprep.subr.bf16.mxu0 %v4120_v0 }
 0x1f3   :  { %2134 = vmatmul.mubr.f32.vlgmr.msra.gmra.mrb[0].mxu1 %v94_v5 }
 0x1f4   :  { %3674 = vmatmul.mubr.f32.vlgmr.msra.gmra.mrb[0].mxu0 %v138_v6 }
 0x1f5   :  { %4123 = vmatpush1.bf16.xpose.msra.mxu0 %v4122_v7  ;;  %3743 = vmatprep.mubr.f32.mxu0 %v141_v9 }
 0x1f6   :  { %4125 = vmatprep.subr.bf16.mxu0 %v4124_v8 }
 0x1fd   :  { %4127 = vmatpush1.bf16.xpose.msra.mxu0 %v4126_v12 }
 0x1fe   :  { %3687 = vmatprep.subr.mxu0 %v591_v13 }
 0x205   :  { %3688 = vmatpush1.xpose.msra.mxu0 %v590_v14 }
 0x208   :  { %3744 = vmatmul.mubr.f32.vlgmr.msra.gmra.mrb[0].mxu0 %v140_v15 }
 0x2c6   :  { %v2135_v16 = vpop.f32.mrb[0].mxu1 }
 0x2c7   :  { %v2137_v17 = vpop.f32.mrb[1].mxu1  ;;  %v4128_v19 = vadd.f32 %v3767_v18, %v2135_v16 }
 0x2db   :  { %v3745_v20 = vpop.f32.mrb[0].mxu0 }
 0x2dc   :  { %v4129_v21 = vadd.f32 %v4128_v19, %v3745_v20  ;;  %v3747_v22 = vpop.f32.mrb[1].mxu0 }
 0x2de   :  { %3750 = vst.msk [vmem:[#allocation8] sm:$0xff] %vm3749_vm0, %v4129_v21 }
 0x2df   :  { %4299 = shalt.err (!%p4296_p0)
}
 0x2e0   :  { %s4300_s26 = scalar_lea.hbm %s4393_s3, 128 }
 0x2e1   :  { %p4301_p1 = scmp.ne.s32.totalorder %s4393_s3, %s4300_s26  ;;  %p4304_p2 = scmp.lt.u32.totalorder %s4300_s26, %s4393_s3 }
 0x2e3   :  { %p4306_p3 = pnand %p4304_p2, %p4301_p1 }
 0x2e5   :  { %4309 = shalt.err (!%p4306_p3)
}
 0x2e6   :  { %3760 = dma.vmem_to_hbm [thread:$0]  %s3758_s22, 128, %s4393_s3, [#allocation4]  }
 0x2e7   :  { %4314 = dma.done.wait [#allocation4], 128  }
 0x2e8   :  { %4315 = vsyncadd [#allocation4], 4294967168 }
 0x2e9   :  { %3764 = vsyncpa [#allocation3], 1 }
 0x2ea   :  { %3765 = vsyncpa [#allocation6], 1 }
 0x2eb   :  { %3766 = vsyncpa [#allocation4], 1 }

</bundles_post_ra>
